<compile_context>
chip_gen: v7x
topology: tpu7x:2x2x1
jax: 0.10.0
libtpu: 0.0.40
codegen_flags: <defaults>
</compile_context>

<pallas_src>
import functools

import numpy as np
import jax
import jax.numpy as jnp
from jax import lax
from jax.experimental import pallas as pl
from jax.experimental.pallas import tpu as pltpu


# ---------------------------------------------------------------------------
# Kernel A: conv1(3x3x3) + BN(eval, folded) + ReLU + conv2(1x1x1)
# ---------------------------------------------------------------------------
def _conv1_bn_relu_conv2_kernel(x0_ref, x1_ref, x2_ref, w1_ref, shift_ref,
                                w2_ref, o_ref, *, H, W, C, C2):
    # x{0,1,2}_ref: (1, H+2, W+2, C)  depth taps kd=0,1,2 of the padded input
    # w1_ref      : (27*C, C)         conv1 weights with BN scale folded in
    # shift_ref   : (1, C)            BN shift
    # w2_ref      : (C, C2)           1x1x1 conv weights
    # o_ref       : (1, H, W, C2)
    acc = jnp.zeros((H * W, C), jnp.float32)
    tap = 0
    for x_ref in (x0_ref, x1_ref, x2_ref):           # kd = 0, 1, 2
        xs = x_ref[0]                                 # (H+2, W+2, C) in VMEM
        for kh in range(3):
            for kw in range(3):
                patch = xs[kh:kh + H, kw:kw + W, :].reshape(H * W, C)
                acc = acc + jnp.dot(patch, w1_ref[tap * C:(tap + 1) * C, :],
                                    preferred_element_type=jnp.float32)
                tap += 1
    acc = jnp.maximum(acc + shift_ref[...], 0.0)      # BN shift + ReLU
    out = jnp.dot(acc, w2_ref[...], preferred_element_type=jnp.float32)
    o_ref[...] = out.reshape(1, H, W, C2)


def _conv2_only_kernel(x_ref, w2_ref, o_ref, *, H, W, C, C2):
    # first=True path: only the 1x1x1 conv (commuted ahead of the upsample).
    out = jnp.dot(x_ref[0].reshape(H * W, C), w2_ref[...],
                  preferred_element_type=jnp.float32)
    o_ref[...] = out.reshape(1, H, W, C2)


# ---------------------------------------------------------------------------
# Kernel B: trilinear x2 upsample along D and H (align_corners=False) + ReLU
# ---------------------------------------------------------------------------
def _upsample2x2_relu_kernel(zm_ref, zc_ref, zp_ref, o_ref):
    # z{m,c,p}_ref: (1, 1, H, W*C2) conv output at depth d-1 / d / d+1 (clamped)
    # o_ref       : (2, 2, H, W*C2) -> [depth parity][height parity][h][w*c2]
    prev = zm_ref[0, 0]
    cur = zc_ref[0, 0]
    nxt = zp_ref[0, 0]
    # Depth blend -> output depths 2d and 2d+1.  The clamped index maps make
    # the boundary rows reduce to exact copies (PyTorch edge handling).
    slabs = (0.25 * prev + 0.75 * cur,    # output depth 2d
             0.75 * cur + 0.25 * nxt)     # output depth 2d+1
    for s, slab in enumerate(slabs):
        up = jnp.concatenate([slab[:1], slab[:-1]], axis=0)   # row j-1 (clamped)
        dn = jnp.concatenate([slab[1:], slab[-1:]], axis=0)   # row j+1 (clamped)
        o_ref[s, 0] = jnp.maximum(0.25 * up + 0.75 * slab, 0.0)   # height 2j
        o_ref[s, 1] = jnp.maximum(0.75 * slab + 0.25 * dn, 0.0)   # height 2j+1


# ---------------------------------------------------------------------------
# KnetU forward (Pallas path, NCDHW in / NCDHW out)
# ---------------------------------------------------------------------------
def knetu_forward(x_ncdhw, params, first=False, eps=1e-5):
    n, c, d, h, w = x_ncdhw.shape
    c2 = params["w2"].shape[0]
    L = w * c2

    x_cl = jnp.transpose(x_ncdhw, (0, 2, 3, 4, 1)).astype(jnp.float32)  # NDHWC
    w2f = params["w2"].reshape(c2, c).T.astype(jnp.float32)             # (C, C2)

    cp = pltpu.CompilerParams(dimension_semantics=("parallel", "parallel"),
                              vmem_limit_bytes=32 * 1024 * 1024)

    if not first:
        # Fold BN (eval mode) scale into the conv1 weights; pass only the shift.
        bn_scale = params["gamma"] / jnp.sqrt(params["rvar"] + eps)
        bn_shift = params["beta"] - params["rmean"] * bn_scale
        w1f = (jnp.transpose(params["w1"], (2, 3, 4, 1, 0)).reshape(27 * c, c)
               * bn_scale[None, :]).astype(jnp.float32)
        shift = bn_shift.reshape(1, c).astype(jnp.float32)

        xp = jnp.pad(x_cl, ((0, 0), (1, 1), (1, 1), (1, 1), (0, 0)))
        xp = xp.reshape(n * (d + 2), h + 2, w + 2, c)   # flat (batch, padded-depth)

        def x_spec(kd):
            return pl.BlockSpec(
                (1, h + 2, w + 2, c),
                lambda b, di, kd=kd: (b * (d + 2) + di + kd, 0, 0, 0))

        z = pl.pallas_call(
            functools.partial(_conv1_bn_relu_conv2_kernel, H=h, W=w, C=c, C2=c2),
            out_shape=jax.ShapeDtypeStruct((n * d, h, w, c2), jnp.float32),
            grid=(n, d),
            in_specs=[x_spec(0), x_spec(1), x_spec(2),
                      pl.BlockSpec((27 * c, c), lambda b, di: (0, 0)),
                      pl.BlockSpec((1, c), lambda b, di: (0, 0)),
                      pl.BlockSpec((c, c2), lambda b, di: (0, 0))],
            out_specs=pl.BlockSpec((1, h, w, c2),
                                   lambda b, di: (b * d + di, 0, 0, 0)),
            compiler_params=cp,
        )(xp, xp, xp, w1f, shift, w2f)
    else:
        x4 = x_cl.reshape(n * d, h, w, c)
        z = pl.pallas_call(
            functools.partial(_conv2_only_kernel, H=h, W=w, C=c, C2=c2),
            out_shape=jax.ShapeDtypeStruct((n * d, h, w, c2), jnp.float32),
            grid=(n, d),
            in_specs=[pl.BlockSpec((1, h, w, c),
                                   lambda b, di: (b * d + di, 0, 0, 0)),
                      pl.BlockSpec((c, c2), lambda b, di: (0, 0))],
            out_specs=pl.BlockSpec((1, h, w, c2),
                                   lambda b, di: (b * d + di, 0, 0, 0)),
            compiler_params=cp,
        )(x4, w2f)

    # Kernel B: x2 trilinear upsample along D and H + final ReLU.
    z2 = z.reshape(n, d, h, L)   # free reshape: lane dim becomes W*C2

    def z_spec(off):
        return pl.BlockSpec(
            (1, 1, h, L),
            lambda b, di, off=off: (b, jnp.clip(di + off, 0, d - 1), 0, 0))

    y = pl.pallas_call(
        _upsample2x2_relu_kernel,
        out_shape=jax.ShapeDtypeStruct((n * 2 * d, 2, h, L), jnp.float32),
        grid=(n, d),
        in_specs=[z_spec(-1), z_spec(0), z_spec(1)],
        out_specs=pl.BlockSpec((2, 2, h, L), lambda b, di: (b * d + di, 0, 0, 0)),
        compiler_params=cp,
    )(z2, z2, z2)

    # (n*2d, 2, h, w, c2) -> NCDHW.  The height-parity interleave is folded
    # into the single output transpose required for the NCDHW API anyway.
    y = y.reshape(n, 2 * d, 2, h, w, c2)
    y = jnp.transpose(y, (0, 5, 1, 3, 2, 4))          # (n, c2, 2d, h, 2, w)
    return y.reshape(n, c2, 2 * d, 2 * h, w)


# ---------------------------------------------------------------------------
# Pure-JAX reference (full f32 / HIGHEST precision) for validation
# ---------------------------------------------------------------------------
def upsample_matrix_linear(in_size, out_size):
    scale = in_size / out_size
    o = np.arange(out_size)
    src = np.maximum((o + 0.5) * scale - 0.5, 0.0)
    i0 = np.minimum(np.floor(src).astype(np.int64), in_size - 1)
    frac = src - i0
    i1 = np.minimum(i0 + 1, in_size - 1)
    M = np.zeros((out_size, in_size), np.float32)
    M[o, i0] += (1.0 - frac)
    M[o, i1] += frac
    return jnp.asarray(M)


def knetu_reference(x, params, first=False, eps=1e-5):
    hi = lax.Precision.HIGHEST
    y = x.astype(jnp.float32)
    if not first:
        y = lax.conv_general_dilated(
            y, params["w1"], (1, 1, 1), ((1, 1), (1, 1), (1, 1)),
            dimension_numbers=("NCDHW", "OIDHW", "NCDHW"), precision=hi)
        sc = params["gamma"] / jnp.sqrt(params["rvar"] + eps)
        sh = params["beta"] - params["rmean"] * sc
        y = jnp.maximum(y * sc[None, :, None, None, None]
                        + sh[None, :, None, None, None], 0.0)
    n, c, d, h, w = y.shape
    UD = upsample_matrix_linear(d, 2 * d)
    UH = upsample_matrix_linear(h, 2 * h)
    y = jnp.einsum("ncdhw,Dd->ncDhw", y, UD, precision=hi)
    y = jnp.einsum("ncdhw,Hh->ncdHw", y, UH, precision=hi)
    c2 = params["w2"].shape[0]
    y = jnp.einsum("ncdhw,oc->nodhw", y, params["w2"].reshape(c2, c), precision=hi)
    return jnp.maximum(y, 0.0)


# ---------------------------------------------------------------------------
if __name__ == "__main__":
    N, C, D, H, W = 2, 8, 8, 8, 8          # planes = 8 -> output channels = 4

    key = jax.random.PRNGKey(0)
    kx, k1, k2, k3, k4, k5, k6 = jax.random.split(key, 7)

    x = jax.random.normal(kx, (N, C, D, H, W), jnp.float32)
    params = {
        "w1": 0.1 * jax.random.normal(k1, (C, C, 3, 3, 3), jnp.float32),
        "w2": 0.3 * jax.random.normal(k2, (C // 2, C, 1, 1, 1), jnp.float32),
        "gamma": 1.0 + 0.1 * jax.random.normal(k3, (C,), jnp.float32),
        "beta": 0.1 * jax.random.normal(k4, (C,), jnp.float32),
        "rmean": 0.1 * jax.random.normal(k5, (C,), jnp.float32),
        "rvar": 1.0 + 0.1 * jax.random.uniform(k6, (C,), jnp.float32),
    }
    # TODO(synk): BatchNorm3d is implemented with eval-mode (running-stat)
    # semantics; PyTorch train-mode batch statistics are not modeled here.

    fwd = jax.jit(knetu_forward, static_argnames=("first",))

    # first=False (default module configuration)
    out = jax.block_until_ready(fwd(x, params, first=False))
    ref = jax.block_until_ready(knetu_reference(x, params, first=False))
    assert out.shape == (N, C // 2, 2 * D, 2 * H, W), out.shape
    # tolerance: kernels use the native (single bf16 pass) MXU path per the
    # perf review; the reference runs in full f32 HIGHEST precision.
    np.testing.assert_allclose(np.asarray(out), np.asarray(ref),
                               rtol=2e-2, atol=2e-2)

    # first=True path (conv1/bn1 skipped)
    out_f = jax.block_until_ready(fwd(x, params, first=True))
    ref_f = jax.block_until_ready(knetu_reference(x, params, first=True))
    assert out_f.shape == (N, C // 2, 2 * D, 2 * H, W), out_f.shape
    np.testing.assert_allclose(np.asarray(out_f), np.asarray(ref_f),
                               rtol=2e-2, atol=2e-2)

    print("KERNEL_OK")
</pallas_src>

<mosaic_0001>
module attributes {stable_mosaic.version = 11 : i64} {
  func.func @_conv1_bn_relu_conv2_kernel(%arg0: i32, %arg1: i32, %arg2: memref<1x10x10x8xf32, #tpu.memory_space<vmem>>, %arg3: memref<1x10x10x8xf32, #tpu.memory_space<vmem>>, %arg4: memref<1x10x10x8xf32, #tpu.memory_space<vmem>>, %arg5: memref<216x8xf32, #tpu.memory_space<vmem>>, %arg6: memref<1x8xf32, #tpu.memory_space<vmem>>, %arg7: memref<8x4xf32, #tpu.memory_space<vmem>>, %arg8: memref<1x8x8x4xf32, #tpu.memory_space<vmem>>) attributes {dimension_semantics = [#tpu.dimension_semantics<parallel>, #tpu.dimension_semantics<parallel>], iteration_bounds = array<i64: 2, 8>, scalar_prefetch = 0 : i64, scratch_operands = 0 : i64, tpu.core_type = #tpu.core_type<tc>, window_params = [{transform_indices = @transform_0, window_bounds = array<i64: 1, 10, 10, 8>}, {transform_indices = @transform_1, window_bounds = array<i64: 1, 10, 10, 8>}, {transform_indices = @transform_2, window_bounds = array<i64: 1, 10, 10, 8>}, {pipeline_mode = #tpu.pipeline_mode<synchronous>, transform_indices = @transform_3, window_bounds = array<i64: 216, 8>}, {pipeline_mode = #tpu.pipeline_mode<synchronous>, transform_indices = @transform_4, window_bounds = array<i64: 1, 8>}, {pipeline_mode = #tpu.pipeline_mode<synchronous>, transform_indices = @transform_5, window_bounds = array<i64: 8, 4>}, {transform_indices = @transform_6, window_bounds = array<i64: 1, 8, 8, 4>}]} {
    %cst = arith.constant 0.000000e+00 : f32
    %0 = vector.broadcast %cst : f32 to vector<64x8xf32>
    %c0 = arith.constant 0 : index
    %c0_0 = arith.constant 0 : index
    %c0_1 = arith.constant 0 : index
    %c0_2 = arith.constant 0 : index
    %1 = vector.load %arg2[%c0, %c0_0, %c0_1, %c0_2] : memref<1x10x10x8xf32, #tpu.memory_space<vmem>>, vector<1x10x10x8xf32>
    %2 = vector.shape_cast %1 : vector<1x10x10x8xf32> to vector<10x10x8xf32>
    %3 = vector.extract_strided_slice %2 {offsets = [0, 0, 0], sizes = [8, 8, 8], strides = [1, 1, 1]} : vector<10x10x8xf32> to vector<8x8x8xf32>
    %4 = vector.shape_cast %3 : vector<8x8x8xf32> to vector<64x8xf32>
    %c0_3 = arith.constant 0 : index
    %c0_4 = arith.constant 0 : index
    %5 = vector.load %arg5[%c0_3, %c0_4] : memref<216x8xf32, #tpu.memory_space<vmem>>, vector<8x8xf32>
    %cst_5 = arith.constant dense<0.000000e+00> : vector<64x8xf32>
    %6 = tpu.matmul %4, %5, %cst_5 {dimension_numbers = #tpu.dot_dimension_numbers<[1], [0], [0], [1], [0, 0, 1, 1], [], []>} : vector<64x8xf32>, vector<8x8xf32>, vector<64x8xf32> -> vector<64x8xf32>
    %7 = arith.addf %0, %6 : vector<64x8xf32>
    %8 = vector.extract_strided_slice %2 {offsets = [0, 1, 0], sizes = [8, 8, 8], strides = [1, 1, 1]} : vector<10x10x8xf32> to vector<8x8x8xf32>
    %9 = vector.shape_cast %8 : vector<8x8x8xf32> to vector<64x8xf32>
    %c8 = arith.constant 8 : index
    %c0_6 = arith.constant 0 : index
    %10 = vector.load %arg5[%c8, %c0_6] : memref<216x8xf32, #tpu.memory_space<vmem>>, vector<8x8xf32>
    %cst_7 = arith.constant dense<0.000000e+00> : vector<64x8xf32>
    %11 = tpu.matmul %9, %10, %cst_7 {dimension_numbers = #tpu.dot_dimension_numbers<[1], [0], [0], [1], [0, 0, 1, 1], [], []>} : vector<64x8xf32>, vector<8x8xf32>, vector<64x8xf32> -> vector<64x8xf32>
    %12 = arith.addf %7, %11 : vector<64x8xf32>
    %13 = vector.extract_strided_slice %2 {offsets = [0, 2, 0], sizes = [8, 8, 8], strides = [1, 1, 1]} : vector<10x10x8xf32> to vector<8x8x8xf32>
    %14 = vector.shape_cast %13 : vector<8x8x8xf32> to vector<64x8xf32>
    %c16 = arith.constant 16 : index
    %c0_8 = arith.constant 0 : index
    %15 = vector.load %arg5[%c16, %c0_8] : memref<216x8xf32, #tpu.memory_space<vmem>>, vector<8x8xf32>
    %cst_9 = arith.constant dense<0.000000e+00> : vector<64x8xf32>
    %16 = tpu.matmul %14, %15, %cst_9 {dimension_numbers = #tpu.dot_dimension_numbers<[1], [0], [0], [1], [0, 0, 1, 1], [], []>} : vector<64x8xf32>, vector<8x8xf32>, vector<64x8xf32> -> vector<64x8xf32>
    %17 = arith.addf %12, %16 : vector<64x8xf32>
    %18 = vector.extract_strided_slice %2 {offsets = [1, 0, 0], sizes = [8, 8, 8], strides = [1, 1, 1]} : vector<10x10x8xf32> to vector<8x8x8xf32>
    %19 = vector.shape_cast %18 : vector<8x8x8xf32> to vector<64x8xf32>
    %c24 = arith.constant 24 : index
    %c0_10 = arith.constant 0 : index
    %20 = vector.load %arg5[%c24, %c0_10] : memref<216x8xf32, #tpu.memory_space<vmem>>, vector<8x8xf32>
    %cst_11 = arith.constant dense<0.000000e+00> : vector<64x8xf32>
    %21 = tpu.matmul %19, %20, %cst_11 {dimension_numbers = #tpu.dot_dimension_numbers<[1], [0], [0], [1], [0, 0, 1, 1], [], []>} : vector<64x8xf32>, vector<8x8xf32>, vector<64x8xf32> -> vector<64x8xf32>
    %22 = arith.addf %17, %21 : vector<64x8xf32>
    %23 = vector.extract_strided_slice %2 {offsets = [1, 1, 0], sizes = [8, 8, 8], strides = [1, 1, 1]} : vector<10x10x8xf32> to vector<8x8x8xf32>
    %24 = vector.shape_cast %23 : vector<8x8x8xf32> to vector<64x8xf32>
    %c32 = arith.constant 32 : index
    %c0_12 = arith.constant 0 : index
    %25 = vector.load %arg5[%c32, %c0_12] : memref<216x8xf32, #tpu.memory_space<vmem>>, vector<8x8xf32>
    %cst_13 = arith.constant dense<0.000000e+00> : vector<64x8xf32>
    %26 = tpu.matmul %24, %25, %cst_13 {dimension_numbers = #tpu.dot_dimension_numbers<[1], [0], [0], [1], [0, 0, 1, 1], [], []>} : vector<64x8xf32>, vector<8x8xf32>, vector<64x8xf32> -> vector<64x8xf32>
    %27 = arith.addf %22, %26 : vector<64x8xf32>
    %28 = vector.extract_strided_slice %2 {offsets = [1, 2, 0], sizes = [8, 8, 8], strides = [1, 1, 1]} : vector<10x10x8xf32> to vector<8x8x8xf32>
    %29 = vector.shape_cast %28 : vector<8x8x8xf32> to vector<64x8xf32>
    %c40 = arith.constant 40 : index
    %c0_14 = arith.constant 0 : index
    %30 = vector.load %arg5[%c40, %c0_14] : memref<216x8xf32, #tpu.memory_space<vmem>>, vector<8x8xf32>
    %cst_15 = arith.constant dense<0.000000e+00> : vector<64x8xf32>
    %31 = tpu.matmul %29, %30, %cst_15 {dimension_numbers = #tpu.dot_dimension_numbers<[1], [0], [0], [1], [0, 0, 1, 1], [], []>} : vector<64x8xf32>, vector<8x8xf32>, vector<64x8xf32> -> vector<64x8xf32>
    %32 = arith.addf %27, %31 : vector<64x8xf32>
    %33 = vector.extract_strided_slice %2 {offsets = [2, 0, 0], sizes = [8, 8, 8], strides = [1, 1, 1]} : vector<10x10x8xf32> to vector<8x8x8xf32>
    %34 = vector.shape_cast %33 : vector<8x8x8xf32> to vector<64x8xf32>
    %c48 = arith.constant 48 : index
    %c0_16 = arith.constant 0 : index
    %35 = vector.load %arg5[%c48, %c0_16] : memref<216x8xf32, #tpu.memory_space<vmem>>, vector<8x8xf32>
    %cst_17 = arith.constant dense<0.000000e+00> : vector<64x8xf32>
    %36 = tpu.matmul %34, %35, %cst_17 {dimension_numbers = #tpu.dot_dimension_numbers<[1], [0], [0], [1], [0, 0, 1, 1], [], []>} : vector<64x8xf32>, vector<8x8xf32>, vector<64x8xf32> -> vector<64x8xf32>
    %37 = arith.addf %32, %36 : vector<64x8xf32>
    %38 = vector.extract_strided_slice %2 {offsets = [2, 1, 0], sizes = [8, 8, 8], strides = [1, 1, 1]} : vector<10x10x8xf32> to vector<8x8x8xf32>
    %39 = vector.shape_cast %38 : vector<8x8x8xf32> to vector<64x8xf32>
    %c56 = arith.constant 56 : index
    %c0_18 = arith.constant 0 : index
    %40 = vector.load %arg5[%c56, %c0_18] : memref<216x8xf32, #tpu.memory_space<vmem>>, vector<8x8xf32>
    %cst_19 = arith.constant dense<0.000000e+00> : vector<64x8xf32>
    %41 = tpu.matmul %39, %40, %cst_19 {dimension_numbers = #tpu.dot_dimension_numbers<[1], [0], [0], [1], [0, 0, 1, 1], [], []>} : vector<64x8xf32>, vector<8x8xf32>, vector<64x8xf32> -> vector<64x8xf32>
    %42 = arith.addf %37, %41 : vector<64x8xf32>
    %43 = vector.extract_strided_slice %2 {offsets = [2, 2, 0], sizes = [8, 8, 8], strides = [1, 1, 1]} : vector<10x10x8xf32> to vector<8x8x8xf32>
    %44 = vector.shape_cast %43 : vector<8x8x8xf32> to vector<64x8xf32>
    %c64 = arith.constant 64 : index
    %c0_20 = arith.constant 0 : index
    %45 = vector.load %arg5[%c64, %c0_20] : memref<216x8xf32, #tpu.memory_space<vmem>>, vector<8x8xf32>
    %cst_21 = arith.constant dense<0.000000e+00> : vector<64x8xf32>
    %46 = tpu.matmul %44, %45, %cst_21 {dimension_numbers = #tpu.dot_dimension_numbers<[1], [0], [0], [1], [0, 0, 1, 1], [], []>} : vector<64x8xf32>, vector<8x8xf32>, vector<64x8xf32> -> vector<64x8xf32>
    %47 = arith.addf %42, %46 : vector<64x8xf32>
    %c0_22 = arith.constant 0 : index
    %c0_23 = arith.constant 0 : index
    %c0_24 = arith.constant 0 : index
    %c0_25 = arith.constant 0 : index
    %48 = vector.load %arg3[%c0_22, %c0_23, %c0_24, %c0_25] : memref<1x10x10x8xf32, #tpu.memory_space<vmem>>, vector<1x10x10x8xf32>
    %49 = vector.shape_cast %48 : vector<1x10x10x8xf32> to vector<10x10x8xf32>
    %50 = vector.extract_strided_slice %49 {offsets = [0, 0, 0], sizes = [8, 8, 8], strides = [1, 1, 1]} : vector<10x10x8xf32> to vector<8x8x8xf32>
    %51 = vector.shape_cast %50 : vector<8x8x8xf32> to vector<64x8xf32>
    %c72 = arith.constant 72 : index
    %c0_26 = arith.constant 0 : index
    %52 = vector.load %arg5[%c72, %c0_26] : memref<216x8xf32, #tpu.memory_space<vmem>>, vector<8x8xf32>
    %cst_27 = arith.constant dense<0.000000e+00> : vector<64x8xf32>
    %53 = tpu.matmul %51, %52, %cst_27 {dimension_numbers = #tpu.dot_dimension_numbers<[1], [0], [0], [1], [0, 0, 1, 1], [], []>} : vector<64x8xf32>, vector<8x8xf32>, vector<64x8xf32> -> vector<64x8xf32>
    %54 = arith.addf %47, %53 : vector<64x8xf32>
    %55 = vector.extract_strided_slice %49 {offsets = [0, 1, 0], sizes = [8, 8, 8], strides = [1, 1, 1]} : vector<10x10x8xf32> to vector<8x8x8xf32>
    %56 = vector.shape_cast %55 : vector<8x8x8xf32> to vector<64x8xf32>
    %c80 = arith.constant 80 : index
    %c0_28 = arith.constant 0 : index
    %57 = vector.load %arg5[%c80, %c0_28] : memref<216x8xf32, #tpu.memory_space<vmem>>, vector<8x8xf32>
    %cst_29 = arith.constant dense<0.000000e+00> : vector<64x8xf32>
    %58 = tpu.matmul %56, %57, %cst_29 {dimension_numbers = #tpu.dot_dimension_numbers<[1], [0], [0], [1], [0, 0, 1, 1], [], []>} : vector<64x8xf32>, vector<8x8xf32>, vector<64x8xf32> -> vector<64x8xf32>
    %59 = arith.addf %54, %58 : vector<64x8xf32>
    %60 = vector.extract_strided_slice %49 {offsets = [0, 2, 0], sizes = [8, 8, 8], strides = [1, 1, 1]} : vector<10x10x8xf32> to vector<8x8x8xf32>
    %61 = vector.shape_cast %60 : vector<8x8x8xf32> to vector<64x8xf32>
    %c88 = arith.constant 88 : index
    %c0_30 = arith.constant 0 : index
    %62 = vector.load %arg5[%c88, %c0_30] : memref<216x8xf32, #tpu.memory_space<vmem>>, vector<8x8xf32>
    %cst_31 = arith.constant dense<0.000000e+00> : vector<64x8xf32>
    %63 = tpu.matmul %61, %62, %cst_31 {dimension_numbers = #tpu.dot_dimension_numbers<[1], [0], [0], [1], [0, 0, 1, 1], [], []>} : vector<64x8xf32>, vector<8x8xf32>, vector<64x8xf32> -> vector<64x8xf32>
    %64 = arith.addf %59, %63 : vector<64x8xf32>
    %65 = vector.extract_strided_slice %49 {offsets = [1, 0, 0], sizes = [8, 8, 8], strides = [1, 1, 1]} : vector<10x10x8xf32> to vector<8x8x8xf32>
    %66 = vector.shape_cast %65 : vector<8x8x8xf32> to vector<64x8xf32>
    %c96 = arith.constant 96 : index
    %c0_32 = arith.constant 0 : index
    %67 = vector.load %arg5[%c96, %c0_32] : memref<216x8xf32, #tpu.memory_space<vmem>>, vector<8x8xf32>
    %cst_33 = arith.constant dense<0.000000e+00> : vector<64x8xf32>
    %68 = tpu.matmul %66, %67, %cst_33 {dimension_numbers = #tpu.dot_dimension_numbers<[1], [0], [0], [1], [0, 0, 1, 1], [], []>} : vector<64x8xf32>, vector<8x8xf32>, vector<64x8xf32> -> vector<64x8xf32>
    %69 = arith.addf %64, %68 : vector<64x8xf32>
    %70 = vector.extract_strided_slice %49 {offsets = [1, 1, 0], sizes = [8, 8, 8], strides = [1, 1, 1]} : vector<10x10x8xf32> to vector<8x8x8xf32>
    %71 = vector.shape_cast %70 : vector<8x8x8xf32> to vector<64x8xf32>
    %c104 = arith.constant 104 : index
    %c0_34 = arith.constant 0 : index
    %72 = vector.load %arg5[%c104, %c0_34] : memref<216x8xf32, #tpu.memory_space<vmem>>, vector<8x8xf32>
    %cst_35 = arith.constant dense<0.000000e+00> : vector<64x8xf32>
    %73 = tpu.matmul %71, %72, %cst_35 {dimension_numbers = #tpu.dot_dimension_numbers<[1], [0], [0], [1], [0, 0, 1, 1], [], []>} : vector<64x8xf32>, vector<8x8xf32>, vector<64x8xf32> -> vector<64x8xf32>
    %74 = arith.addf %69, %73 : vector<64x8xf32>
    %75 = vector.extract_strided_slice %49 {offsets = [1, 2, 0], sizes = [8, 8, 8], strides = [1, 1, 1]} : vector<10x10x8xf32> to vector<8x8x8xf32>
    %76 = vector.shape_cast %75 : vector<8x8x8xf32> to vector<64x8xf32>
    %c112 = arith.constant 112 : index
    %c0_36 = arith.constant 0 : index
    %77 = vector.load %arg5[%c112, %c0_36] : memref<216x8xf32, #tpu.memory_space<vmem>>, vector<8x8xf32>
    %cst_37 = arith.constant dense<0.000000e+00> : vector<64x8xf32>
    %78 = tpu.matmul %76, %77, %cst_37 {dimension_numbers = #tpu.dot_dimension_numbers<[1], [0], [0], [1], [0, 0, 1, 1], [], []>} : vector<64x8xf32>, vector<8x8xf32>, vector<64x8xf32> -> vector<64x8xf32>
    %79 = arith.addf %74, %78 : vector<64x8xf32>
    %80 = vector.extract_strided_slice %49 {offsets = [2, 0, 0], sizes = [8, 8, 8], strides = [1, 1, 1]} : vector<10x10x8xf32> to vector<8x8x8xf32>
    %81 = vector.shape_cast %80 : vector<8x8x8xf32> to vector<64x8xf32>
    %c120 = arith.constant 120 : index
    %c0_38 = arith.constant 0 : index
    %82 = vector.load %arg5[%c120, %c0_38] : memref<216x8xf32, #tpu.memory_space<vmem>>, vector<8x8xf32>
    %cst_39 = arith.constant dense<0.000000e+00> : vector<64x8xf32>
    %83 = tpu.matmul %81, %82, %cst_39 {dimension_numbers = #tpu.dot_dimension_numbers<[1], [0], [0], [1], [0, 0, 1, 1], [], []>} : vector<64x8xf32>, vector<8x8xf32>, vector<64x8xf32> -> vector<64x8xf32>
    %84 = arith.addf %79, %83 : vector<64x8xf32>
    %85 = vector.extract_strided_slice %49 {offsets = [2, 1, 0], sizes = [8, 8, 8], strides = [1, 1, 1]} : vector<10x10x8xf32> to vector<8x8x8xf32>
    %86 = vector.shape_cast %85 : vector<8x8x8xf32> to vector<64x8xf32>
    %c128 = arith.constant 128 : index
    %c0_40 = arith.constant 0 : index
    %87 = vector.load %arg5[%c128, %c0_40] : memref<216x8xf32, #tpu.memory_space<vmem>>, vector<8x8xf32>
    %cst_41 = arith.constant dense<0.000000e+00> : vector<64x8xf32>
    %88 = tpu.matmul %86, %87, %cst_41 {dimension_numbers = #tpu.dot_dimension_numbers<[1], [0], [0], [1], [0, 0, 1, 1], [], []>} : vector<64x8xf32>, vector<8x8xf32>, vector<64x8xf32> -> vector<64x8xf32>
    %89 = arith.addf %84, %88 : vector<64x8xf32>
    %90 = vector.extract_strided_slice %49 {offsets = [2, 2, 0], sizes = [8, 8, 8], strides = [1, 1, 1]} : vector<10x10x8xf32> to vector<8x8x8xf32>
    %91 = vector.shape_cast %90 : vector<8x8x8xf32> to vector<64x8xf32>
    %c136 = arith.constant 136 : index
    %c0_42 = arith.constant 0 : index
    %92 = vector.load %arg5[%c136, %c0_42] : memref<216x8xf32, #tpu.memory_space<vmem>>, vector<8x8xf32>
    %cst_43 = arith.constant dense<0.000000e+00> : vector<64x8xf32>
    %93 = tpu.matmul %91, %92, %cst_43 {dimension_numbers = #tpu.dot_dimension_numbers<[1], [0], [0], [1], [0, 0, 1, 1], [], []>} : vector<64x8xf32>, vector<8x8xf32>, vector<64x8xf32> -> vector<64x8xf32>
    %94 = arith.addf %89, %93 : vector<64x8xf32>
    %c0_44 = arith.constant 0 : index
    %c0_45 = arith.constant 0 : index
    %c0_46 = arith.constant 0 : index
    %c0_47 = arith.constant 0 : index
    %95 = vector.load %arg4[%c0_44, %c0_45, %c0_46, %c0_47] : memref<1x10x10x8xf32, #tpu.memory_space<vmem>>, vector<1x10x10x8xf32>
    %96 = vector.shape_cast %95 : vector<1x10x10x8xf32> to vector<10x10x8xf32>
    %97 = vector.extract_strided_slice %96 {offsets = [0, 0, 0], sizes = [8, 8, 8], strides = [1, 1, 1]} : vector<10x10x8xf32> to vector<8x8x8xf32>
    %98 = vector.shape_cast %97 : vector<8x8x8xf32> to vector<64x8xf32>
    %c144 = arith.constant 144 : index
    %c0_48 = arith.constant 0 : index
    %99 = vector.load %arg5[%c144, %c0_48] : memref<216x8xf32, #tpu.memory_space<vmem>>, vector<8x8xf32>
    %cst_49 = arith.constant dense<0.000000e+00> : vector<64x8xf32>
    %100 = tpu.matmul %98, %99, %cst_49 {dimension_numbers = #tpu.dot_dimension_numbers<[1], [0], [0], [1], [0, 0, 1, 1], [], []>} : vector<64x8xf32>, vector<8x8xf32>, vector<64x8xf32> -> vector<64x8xf32>
    %101 = arith.addf %94, %100 : vector<64x8xf32>
    %102 = vector.extract_strided_slice %96 {offsets = [0, 1, 0], sizes = [8, 8, 8], strides = [1, 1, 1]} : vector<10x10x8xf32> to vector<8x8x8xf32>
    %103 = vector.shape_cast %102 : vector<8x8x8xf32> to vector<64x8xf32>
    %c152 = arith.constant 152 : index
    %c0_50 = arith.constant 0 : index
    %104 = vector.load %arg5[%c152, %c0_50] : memref<216x8xf32, #tpu.memory_space<vmem>>, vector<8x8xf32>
    %cst_51 = arith.constant dense<0.000000e+00> : vector<64x8xf32>
    %105 = tpu.matmul %103, %104, %cst_51 {dimension_numbers = #tpu.dot_dimension_numbers<[1], [0], [0], [1], [0, 0, 1, 1], [], []>} : vector<64x8xf32>, vector<8x8xf32>, vector<64x8xf32> -> vector<64x8xf32>
    %106 = arith.addf %101, %105 : vector<64x8xf32>
    %107 = vector.extract_strided_slice %96 {offsets = [0, 2, 0], sizes = [8, 8, 8], strides = [1, 1, 1]} : vector<10x10x8xf32> to vector<8x8x8xf32>
    %108 = vector.shape_cast %107 : vector<8x8x8xf32> to vector<64x8xf32>
    %c160 = arith.constant 160 : index
    %c0_52 = arith.constant 0 : index
    %109 = vector.load %arg5[%c160, %c0_52] : memref<216x8xf32, #tpu.memory_space<vmem>>, vector<8x8xf32>
    %cst_53 = arith.constant dense<0.000000e+00> : vector<64x8xf32>
    %110 = tpu.matmul %108, %109, %cst_53 {dimension_numbers = #tpu.dot_dimension_numbers<[1], [0], [0], [1], [0, 0, 1, 1], [], []>} : vector<64x8xf32>, vector<8x8xf32>, vector<64x8xf32> -> vector<64x8xf32>
    %111 = arith.addf %106, %110 : vector<64x8xf32>
    %112 = vector.extract_strided_slice %96 {offsets = [1, 0, 0], sizes = [8, 8, 8], strides = [1, 1, 1]} : vector<10x10x8xf32> to vector<8x8x8xf32>
    %113 = vector.shape_cast %112 : vector<8x8x8xf32> to vector<64x8xf32>
    %c168 = arith.constant 168 : index
    %c0_54 = arith.constant 0 : index
    %114 = vector.load %arg5[%c168, %c0_54] : memref<216x8xf32, #tpu.memory_space<vmem>>, vector<8x8xf32>
    %cst_55 = arith.constant dense<0.000000e+00> : vector<64x8xf32>
    %115 = tpu.matmul %113, %114, %cst_55 {dimension_numbers = #tpu.dot_dimension_numbers<[1], [0], [0], [1], [0, 0, 1, 1], [], []>} : vector<64x8xf32>, vector<8x8xf32>, vector<64x8xf32> -> vector<64x8xf32>
    %116 = arith.addf %111, %115 : vector<64x8xf32>
    %117 = vector.extract_strided_slice %96 {offsets = [1, 1, 0], sizes = [8, 8, 8], strides = [1, 1, 1]} : vector<10x10x8xf32> to vector<8x8x8xf32>
    %118 = vector.shape_cast %117 : vector<8x8x8xf32> to vector<64x8xf32>
    %c176 = arith.constant 176 : index
    %c0_56 = arith.constant 0 : index
    %119 = vector.load %arg5[%c176, %c0_56] : memref<216x8xf32, #tpu.memory_space<vmem>>, vector<8x8xf32>
    %cst_57 = arith.constant dense<0.000000e+00> : vector<64x8xf32>
    %120 = tpu.matmul %118, %119, %cst_57 {dimension_numbers = #tpu.dot_dimension_numbers<[1], [0], [0], [1], [0, 0, 1, 1], [], []>} : vector<64x8xf32>, vector<8x8xf32>, vector<64x8xf32> -> vector<64x8xf32>
    %121 = arith.addf %116, %120 : vector<64x8xf32>
    %122 = vector.extract_strided_slice %96 {offsets = [1, 2, 0], sizes = [8, 8, 8], strides = [1, 1, 1]} : vector<10x10x8xf32> to vector<8x8x8xf32>
    %123 = vector.shape_cast %122 : vector<8x8x8xf32> to vector<64x8xf32>
    %c184 = arith.constant 184 : index
    %c0_58 = arith.constant 0 : index
    %124 = vector.load %arg5[%c184, %c0_58] : memref<216x8xf32, #tpu.memory_space<vmem>>, vector<8x8xf32>
    %cst_59 = arith.constant dense<0.000000e+00> : vector<64x8xf32>
    %125 = tpu.matmul %123, %124, %cst_59 {dimension_numbers = #tpu.dot_dimension_numbers<[1], [0], [0], [1], [0, 0, 1, 1], [], []>} : vector<64x8xf32>, vector<8x8xf32>, vector<64x8xf32> -> vector<64x8xf32>
    %126 = arith.addf %121, %125 : vector<64x8xf32>
    %127 = vector.extract_strided_slice %96 {offsets = [2, 0, 0], sizes = [8, 8, 8], strides = [1, 1, 1]} : vector<10x10x8xf32> to vector<8x8x8xf32>
    %128 = vector.shape_cast %127 : vector<8x8x8xf32> to vector<64x8xf32>
    %c192 = arith.constant 192 : index
    %c0_60 = arith.constant 0 : index
    %129 = vector.load %arg5[%c192, %c0_60] : memref<216x8xf32, #tpu.memory_space<vmem>>, vector<8x8xf32>
    %cst_61 = arith.constant dense<0.000000e+00> : vector<64x8xf32>
    %130 = tpu.matmul %128, %129, %cst_61 {dimension_numbers = #tpu.dot_dimension_numbers<[1], [0], [0], [1], [0, 0, 1, 1], [], []>} : vector<64x8xf32>, vector<8x8xf32>, vector<64x8xf32> -> vector<64x8xf32>
    %131 = arith.addf %126, %130 : vector<64x8xf32>
    %132 = vector.extract_strided_slice %96 {offsets = [2, 1, 0], sizes = [8, 8, 8], strides = [1, 1, 1]} : vector<10x10x8xf32> to vector<8x8x8xf32>
    %133 = vector.shape_cast %132 : vector<8x8x8xf32> to vector<64x8xf32>
    %c200 = arith.constant 200 : index
    %c0_62 = arith.constant 0 : index
    %134 = vector.load %arg5[%c200, %c0_62] : memref<216x8xf32, #tpu.memory_space<vmem>>, vector<8x8xf32>
    %cst_63 = arith.constant dense<0.000000e+00> : vector<64x8xf32>
    %135 = tpu.matmul %133, %134, %cst_63 {dimension_numbers = #tpu.dot_dimension_numbers<[1], [0], [0], [1], [0, 0, 1, 1], [], []>} : vector<64x8xf32>, vector<8x8xf32>, vector<64x8xf32> -> vector<64x8xf32>
    %136 = arith.addf %131, %135 : vector<64x8xf32>
    %137 = vector.extract_strided_slice %96 {offsets = [2, 2, 0], sizes = [8, 8, 8], strides = [1, 1, 1]} : vector<10x10x8xf32> to vector<8x8x8xf32>
    %138 = vector.shape_cast %137 : vector<8x8x8xf32> to vector<64x8xf32>
    %c208 = arith.constant 208 : index
    %c0_64 = arith.constant 0 : index
    %139 = vector.load %arg5[%c208, %c0_64] : memref<216x8xf32, #tpu.memory_space<vmem>>, vector<8x8xf32>
    %cst_65 = arith.constant dense<0.000000e+00> : vector<64x8xf32>
    %140 = tpu.matmul %138, %139, %cst_65 {dimension_numbers = #tpu.dot_dimension_numbers<[1], [0], [0], [1], [0, 0, 1, 1], [], []>} : vector<64x8xf32>, vector<8x8xf32>, vector<64x8xf32> -> vector<64x8xf32>
    %141 = arith.addf %136, %140 : vector<64x8xf32>
    %c0_66 = arith.constant 0 : index
    %c0_67 = arith.constant 0 : index
    %142 = vector.load %arg6[%c0_66, %c0_67] : memref<1x8xf32, #tpu.memory_space<vmem>>, vector<1x8xf32>
    %143 = vector.broadcast %142 : vector<1x8xf32> to vector<64x8xf32>
    %144 = arith.addf %141, %143 : vector<64x8xf32>
    %cst_68 = arith.constant 0.000000e+00 : f32
    %145 = vector.broadcast %cst_68 : f32 to vector<64x8xf32>
    %146 = arith.maximumf %144, %145 : vector<64x8xf32>
    %c0_69 = arith.constant 0 : index
    %c0_70 = arith.constant 0 : index
    %147 = vector.load %arg7[%c0_69, %c0_70] : memref<8x4xf32, #tpu.memory_space<vmem>>, vector<8x4xf32>
    %cst_71 = arith.constant dense<0.000000e+00> : vector<64x4xf32>
    %148 = tpu.matmul %146, %147, %cst_71 {dimension_numbers = #tpu.dot_dimension_numbers<[1], [0], [0], [1], [0, 0, 1, 1], [], []>} : vector<64x8xf32>, vector<8x4xf32>, vector<64x4xf32> -> vector<64x4xf32>
    %149 = vector.shape_cast %148 : vector<64x4xf32> to vector<1x8x8x4xf32>
    %c0_72 = arith.constant 0 : index
    %c0_73 = arith.constant 0 : index
    %c0_74 = arith.constant 0 : index
    %c0_75 = arith.constant 0 : index
    %150 = vector.load %arg8[%c0_72, %c0_73, %c0_74, %c0_75] : memref<1x8x8x4xf32, #tpu.memory_space<vmem>>, vector<1x8x8x4xf32>
    tpu.vector_store %arg8[%c0_72, %c0_73, %c0_74, %c0_75], %149 {strides = array<i32>} : memref<1x8x8x4xf32, #tpu.memory_space<vmem>>, vector<1x8x8x4xf32>,
    return
  }
  func.func @transform_0(%arg0: i32, %arg1: i32) -> (i32, i32, i32, i32) {
    %c10_i32 = arith.constant 10 : i32
    %0 = arith.muli %arg0, %c10_i32 : i32
    %1 = arith.addi %0, %arg1 : i32
    %c0_i32 = arith.constant 0 : i32
    %2 = arith.addi %1, %c0_i32 : i32
    %c0_i32_0 = arith.constant 0 : i32
    %c0_i32_1 = arith.constant 0 : i32
    %c0_i32_2 = arith.constant 0 : i32
    %c0_i32_3 = arith.constant 0 : i32
    return %2, %c0_i32_0, %c0_i32_1, %c0_i32_2 : i32, i32, i32, i32
  }
  func.func @transform_1(%arg0: i32, %arg1: i32) -> (i32, i32, i32, i32) {
    %c10_i32 = arith.constant 10 : i32
    %0 = arith.muli %arg0, %c10_i32 : i32
    %1 = arith.addi %0, %arg1 : i32
    %c1_i32 = arith.constant 1 : i32
    %2 = arith.addi %1, %c1_i32 : i32
    %c0_i32 = arith.constant 0 : i32
    %c0_i32_0 = arith.constant 0 : i32
    %c0_i32_1 = arith.constant 0 : i32
    %c0_i32_2 = arith.constant 0 : i32
    return %2, %c0_i32, %c0_i32_0, %c0_i32_1 : i32, i32, i32, i32
  }
  func.func @transform_2(%arg0: i32, %arg1: i32) -> (i32, i32, i32, i32) {
    %c10_i32 = arith.constant 10 : i32
    %0 = arith.muli %arg0, %c10_i32 : i32
    %1 = arith.addi %0, %arg1 : i32
    %c2_i32 = arith.constant 2 : i32
    %2 = arith.addi %1, %c2_i32 : i32
    %c0_i32 = arith.constant 0 : i32
    %c0_i32_0 = arith.constant 0 : i32
    %c0_i32_1 = arith.constant 0 : i32
    %c0_i32_2 = arith.constant 0 : i32
    return %2, %c0_i32, %c0_i32_0, %c0_i32_1 : i32, i32, i32, i32
  }
  func.func @transform_3(%arg0: i32, %arg1: i32) -> (i32, i32) {
    %c0_i32 = arith.constant 0 : i32
    %c0_i32_0 = arith.constant 0 : i32
    %c0_i32_1 = arith.constant 0 : i32
    return %c0_i32, %c0_i32_0 : i32, i32
  }
  func.func @transform_4(%arg0: i32, %arg1: i32) -> (i32, i32) {
    %c0_i32 = arith.constant 0 : i32
    %c0_i32_0 = arith.constant 0 : i32
    %c0_i32_1 = arith.constant 0 : i32
    return %c0_i32, %c0_i32_0 : i32, i32
  }
  func.func @transform_5(%arg0: i32, %arg1: i32) -> (i32, i32) {
    %c0_i32 = arith.constant 0 : i32
    %c0_i32_0 = arith.constant 0 : i32
    %c0_i32_1 = arith.constant 0 : i32
    return %c0_i32, %c0_i32_0 : i32, i32
  }
  func.func @transform_6(%arg0: i32, %arg1: i32) -> (i32, i32, i32, i32) {
    %c8_i32 = arith.constant 8 : i32
    %0 = arith.muli %arg0, %c8_i32 : i32
    %1 = arith.addi %0, %arg1 : i32
    %c0_i32 = arith.constant 0 : i32
    %c0_i32_0 = arith.constant 0 : i32
    %c0_i32_1 = arith.constant 0 : i32
    %c0_i32_2 = arith.constant 0 : i32
    return %1, %c0_i32, %c0_i32_0, %c0_i32_1 : i32, i32, i32, i32
  }
}

module attributes {stable_mosaic.version = 11 : i64} {
  func.func @_upsample2x2_relu_kernel(%arg0: i32, %arg1: i32, %arg2: memref<1x1x8x32xf32, #tpu.memory_space<vmem>>, %arg3: memref<1x1x8x32xf32, #tpu.memory_space<vmem>>, %arg4: memref<1x1x8x32xf32, #tpu.memory_space<vmem>>, %arg5: memref<2x2x8x32xf32, #tpu.memory_space<vmem>>) attributes {dimension_semantics = [#tpu.dimension_semantics<parallel>, #tpu.dimension_semantics<parallel>], iteration_bounds = array<i64: 2, 8>, scalar_prefetch = 0 : i64, scratch_operands = 0 : i64, tpu.core_type = #tpu.core_type<tc>, window_params = [{transform_indices = @transform_0, window_bounds = array<i64: 1, 1, 8, 32>}, {transform_indices = @transform_1, window_bounds = array<i64: 1, 1, 8, 32>}, {transform_indices = @transform_2, window_bounds = array<i64: 1, 1, 8, 32>}, {transform_indices = @transform_3, window_bounds = array<i64: 2, 2, 8, 32>}]} {
    %c0 = arith.constant 0 : index
    %c0_0 = arith.constant 0 : index
    %c0_1 = arith.constant 0 : index
    %c0_2 = arith.constant 0 : index
    %0 = vector.load %arg2[%c0, %c0_0, %c0_1, %c0_2] : memref<1x1x8x32xf32, #tpu.memory_space<vmem>>, vector<1x1x8x32xf32>
    %1 = vector.shape_cast %0 : vector<1x1x8x32xf32> to vector<8x32xf32>
    %c0_3 = arith.constant 0 : index
    %c0_4 = arith.constant 0 : index
    %c0_5 = arith.constant 0 : index
    %c0_6 = arith.constant 0 : index
    %2 = vector.load %arg3[%c0_3, %c0_4, %c0_5, %c0_6] : memref<1x1x8x32xf32, #tpu.memory_space<vmem>>, vector<1x1x8x32xf32>
    %3 = vector.shape_cast %2 : vector<1x1x8x32xf32> to vector<8x32xf32>
    %c0_7 = arith.constant 0 : index
    %c0_8 = arith.constant 0 : index
    %c0_9 = arith.constant 0 : index
    %c0_10 = arith.constant 0 : index
    %4 = vector.load %arg4[%c0_7, %c0_8, %c0_9, %c0_10] : memref<1x1x8x32xf32, #tpu.memory_space<vmem>>, vector<1x1x8x32xf32>
    %5 = vector.shape_cast %4 : vector<1x1x8x32xf32> to vector<8x32xf32>
    %cst = arith.constant 2.500000e-01 : f32
    %6 = vector.broadcast %cst : f32 to vector<8x32xf32>
    %7 = arith.mulf %6, %1 : vector<8x32xf32>
    %cst_11 = arith.constant 7.500000e-01 : f32
    %8 = vector.broadcast %cst_11 : f32 to vector<8x32xf32>
    %9 = arith.mulf %8, %3 : vector<8x32xf32>
    %10 = arith.addf %7, %9 : vector<8x32xf32>
    %cst_12 = arith.constant 7.500000e-01 : f32
    %11 = vector.broadcast %cst_12 : f32 to vector<8x32xf32>
    %12 = arith.mulf %11, %3 : vector<8x32xf32>
    %cst_13 = arith.constant 2.500000e-01 : f32
    %13 = vector.broadcast %cst_13 : f32 to vector<8x32xf32>
    %14 = arith.mulf %13, %5 : vector<8x32xf32>
    %15 = arith.addf %12, %14 : vector<8x32xf32>
    %16 = vector.extract_strided_slice %10 {offsets = [0, 0], sizes = [1, 32], strides = [1, 1]} : vector<8x32xf32> to vector<1x32xf32>
    %17 = vector.extract_strided_slice %10 {offsets = [0, 0], sizes = [7, 32], strides = [1, 1]} : vector<8x32xf32> to vector<7x32xf32>
    %18 = tpu.concatenate %16, %17 in 0 : vector<1x32xf32>, vector<7x32xf32> -> vector<8x32xf32>
    %19 = vector.extract_strided_slice %10 {offsets = [1, 0], sizes = [7, 32], strides = [1, 1]} : vector<8x32xf32> to vector<7x32xf32>
    %20 = vector.extract_strided_slice %10 {offsets = [7, 0], sizes = [1, 32], strides = [1, 1]} : vector<8x32xf32> to vector<1x32xf32>
    %21 = tpu.concatenate %19, %20 in 0 : vector<7x32xf32>, vector<1x32xf32> -> vector<8x32xf32>
    %cst_14 = arith.constant 2.500000e-01 : f32
    %22 = vector.broadcast %cst_14 : f32 to vector<8x32xf32>
    %23 = arith.mulf %22, %18 : vector<8x32xf32>
    %cst_15 = arith.constant 7.500000e-01 : f32
    %24 = vector.broadcast %cst_15 : f32 to vector<8x32xf32>
    %25 = arith.mulf %24, %10 : vector<8x32xf32>
    %26 = arith.addf %23, %25 : vector<8x32xf32>
    %cst_16 = arith.constant 0.000000e+00 : f32
    %27 = vector.broadcast %cst_16 : f32 to vector<8x32xf32>
    %28 = arith.maximumf %26, %27 : vector<8x32xf32>
    %c0_17 = arith.constant 0 : index
    %c0_18 = arith.constant 0 : index
    %c0_19 = arith.constant 0 : index
    %c0_20 = arith.constant 0 : index
    %29 = vector.load %arg5[%c0_17, %c0_18, %c0_19, %c0_20] : memref<2x2x8x32xf32, #tpu.memory_space<vmem>>, vector<1x1x8x32xf32>
    %30 = vector.shape_cast %29 : vector<1x1x8x32xf32> to vector<8x32xf32>
    %31 = vector.shape_cast %28 : vector<8x32xf32> to vector<1x1x8x32xf32>
    tpu.vector_store %arg5[%c0_17, %c0_18, %c0_19, %c0_20], %31 {strides = array<i32>} : memref<2x2x8x32xf32, #tpu.memory_space<vmem>>, vector<1x1x8x32xf32>,
    %cst_21 = arith.constant 7.500000e-01 : f32
    %32 = vector.broadcast %cst_21 : f32 to vector<8x32xf32>
    %33 = arith.mulf %32, %10 : vector<8x32xf32>
    %cst_22 = arith.constant 2.500000e-01 : f32
    %34 = vector.broadcast %cst_22 : f32 to vector<8x32xf32>
    %35 = arith.mulf %34, %21 : vector<8x32xf32>
    %36 = arith.addf %33, %35 : vector<8x32xf32>
    %cst_23 = arith.constant 0.000000e+00 : f32
    %37 = vector.broadcast %cst_23 : f32 to vector<8x32xf32>
    %38 = arith.maximumf %36, %37 : vector<8x32xf32>
    %c0_24 = arith.constant 0 : index
    %c1 = arith.constant 1 : index
    %c0_25 = arith.constant 0 : index
    %c0_26 = arith.constant 0 : index
    %39 = vector.load %arg5[%c0_24, %c1, %c0_25, %c0_26] : memref<2x2x8x32xf32, #tpu.memory_space<vmem>>, vector<1x1x8x32xf32>
    %40 = vector.shape_cast %39 : vector<1x1x8x32xf32> to vector<8x32xf32>
    %41 = vector.shape_cast %38 : vector<8x32xf32> to vector<1x1x8x32xf32>
    tpu.vector_store %arg5[%c0_24, %c1, %c0_25, %c0_26], %41 {strides = array<i32>} : memref<2x2x8x32xf32, #tpu.memory_space<vmem>>, vector<1x1x8x32xf32>,
    %42 = vector.extract_strided_slice %15 {offsets = [0, 0], sizes = [1, 32], strides = [1, 1]} : vector<8x32xf32> to vector<1x32xf32>
    %43 = vector.extract_strided_slice %15 {offsets = [0, 0], sizes = [7, 32], strides = [1, 1]} : vector<8x32xf32> to vector<7x32xf32>
    %44 = tpu.concatenate %42, %43 in 0 : vector<1x32xf32>, vector<7x32xf32> -> vector<8x32xf32>
    %45 = vector.extract_strided_slice %15 {offsets = [1, 0], sizes = [7, 32], strides = [1, 1]} : vector<8x32xf32> to vector<7x32xf32>
    %46 = vector.extract_strided_slice %15 {offsets = [7, 0], sizes = [1, 32], strides = [1, 1]} : vector<8x32xf32> to vector<1x32xf32>
    %47 = tpu.concatenate %45, %46 in 0 : vector<7x32xf32>, vector<1x32xf32> -> vector<8x32xf32>
    %cst_27 = arith.constant 2.500000e-01 : f32
    %48 = vector.broadcast %cst_27 : f32 to vector<8x32xf32>
    %49 = arith.mulf %48, %44 : vector<8x32xf32>
    %cst_28 = arith.constant 7.500000e-01 : f32
    %50 = vector.broadcast %cst_28 : f32 to vector<8x32xf32>
    %51 = arith.mulf %50, %15 : vector<8x32xf32>
    %52 = arith.addf %49, %51 : vector<8x32xf32>
    %cst_29 = arith.constant 0.000000e+00 : f32
    %53 = vector.broadcast %cst_29 : f32 to vector<8x32xf32>
    %54 = arith.maximumf %52, %53 : vector<8x32xf32>
    %c1_30 = arith.constant 1 : index
    %c0_31 = arith.constant 0 : index
    %c0_32 = arith.constant 0 : index
    %c0_33 = arith.constant 0 : index
    %55 = vector.load %arg5[%c1_30, %c0_31, %c0_32, %c0_33] : memref<2x2x8x32xf32, #tpu.memory_space<vmem>>, vector<1x1x8x32xf32>
    %56 = vector.shape_cast %55 : vector<1x1x8x32xf32> to vector<8x32xf32>
    %57 = vector.shape_cast %54 : vector<8x32xf32> to vector<1x1x8x32xf32>
    tpu.vector_store %arg5[%c1_30, %c0_31, %c0_32, %c0_33], %57 {strides = array<i32>} : memref<2x2x8x32xf32, #tpu.memory_space<vmem>>, vector<1x1x8x32xf32>,
    %cst_34 = arith.constant 7.500000e-01 : f32
    %58 = vector.broadcast %cst_34 : f32 to vector<8x32xf32>
    %59 = arith.mulf %58, %15 : vector<8x32xf32>
    %cst_35 = arith.constant 2.500000e-01 : f32
    %60 = vector.broadcast %cst_35 : f32 to vector<8x32xf32>
    %61 = arith.mulf %60, %47 : vector<8x32xf32>
    %62 = arith.addf %59, %61 : vector<8x32xf32>
    %cst_36 = arith.constant 0.000000e+00 : f32
    %63 = vector.broadcast %cst_36 : f32 to vector<8x32xf32>
    %64 = arith.maximumf %62, %63 : vector<8x32xf32>
    %c1_37 = arith.constant 1 : index
    %c1_38 = arith.constant 1 : index
    %c0_39 = arith.constant 0 : index
    %c0_40 = arith.constant 0 : index
    %65 = vector.load %arg5[%c1_37, %c1_38, %c0_39, %c0_40] : memref<2x2x8x32xf32, #tpu.memory_space<vmem>>, vector<1x1x8x32xf32>
    %66 = vector.shape_cast %65 : vector<1x1x8x32xf32> to vector<8x32xf32>
    %67 = vector.shape_cast %64 : vector<8x32xf32> to vector<1x1x8x32xf32>
    tpu.vector_store %arg5[%c1_37, %c1_38, %c0_39, %c0_40], %67 {strides = array<i32>} : memref<2x2x8x32xf32, #tpu.memory_space<vmem>>, vector<1x1x8x32xf32>,
    return
  }
  func.func @transform_0(%arg0: i32, %arg1: i32) -> (i32, i32, i32, i32) {
    %c-1_i32 = arith.constant -1 : i32
    %0 = arith.addi %arg1, %c-1_i32 : i32
    %c0_i32 = arith.constant 0 : i32
    %c7_i32 = arith.constant 7 : i32
    %1 = arith.maxsi %c0_i32, %0 : i32
    %2 = arith.minsi %c7_i32, %1 : i32
    %c0_i32_0 = arith.constant 0 : i32
    %c0_i32_1 = arith.constant 0 : i32
    %c0_i32_2 = arith.constant 0 : i32
    return %arg0, %2, %c0_i32_0, %c0_i32_1 : i32, i32, i32, i32
  }
  func.func @transform_1(%arg0: i32, %arg1: i32) -> (i32, i32, i32, i32) {
    %c0_i32 = arith.constant 0 : i32
    %0 = arith.addi %arg1, %c0_i32 : i32
    %c0_i32_0 = arith.constant 0 : i32
    %c7_i32 = arith.constant 7 : i32
    %1 = arith.maxsi %c0_i32_0, %0 : i32
    %2 = arith.minsi %c7_i32, %1 : i32
    %c0_i32_1 = arith.constant 0 : i32
    %c0_i32_2 = arith.constant 0 : i32
    %c0_i32_3 = arith.constant 0 : i32
    return %arg0, %2, %c0_i32_1, %c0_i32_2 : i32, i32, i32, i32
  }
  func.func @transform_2(%arg0: i32, %arg1: i32) -> (i32, i32, i32, i32) {
    %c1_i32 = arith.constant 1 : i32
    %0 = arith.addi %arg1, %c1_i32 : i32
    %c0_i32 = arith.constant 0 : i32
    %c7_i32 = arith.constant 7 : i32
    %1 = arith.maxsi %c0_i32, %0 : i32
    %2 = arith.minsi %c7_i32, %1 : i32
    %c0_i32_0 = arith.constant 0 : i32
    %c0_i32_1 = arith.constant 0 : i32
    %c0_i32_2 = arith.constant 0 : i32
    return %arg0, %2, %c0_i32_0, %c0_i32_1 : i32, i32, i32, i32
  }
  func.func @transform_3(%arg0: i32, %arg1: i32) -> (i32, i32, i32, i32) {
    %c8_i32 = arith.constant 8 : i32
    %0 = arith.muli %arg0, %c8_i32 : i32
    %1 = arith.addi %0, %arg1 : i32
    %c0_i32 = arith.constant 0 : i32
    %c0_i32_0 = arith.constant 0 : i32
    %c0_i32_1 = arith.constant 0 : i32
    %c0_i32_2 = arith.constant 0 : i32
    return %1, %c0_i32, %c0_i32_0, %c0_i32_1 : i32, i32, i32, i32
  }
}

</mosaic_0001>

<bundles_post_ra>
// kernel: knetu_forward.3
= control target key start
LH: loop header
LB: loop body
LE: loop exit
PB: predicated region body
PF: predicated region fallthrough
CT: control target
= control target key end

     0   :  { %s717_s12 = smov 0   ;;  %s719_s13 = smov 0   ;;  %s800_s0 = inlined_call_operand.vmem [shape: f32[2,8,8,32], index: 0, kind: input, shape index: {}, may-alias: {0,1,2}]   ;;  %s801_s1 = inlined_call_operand.vmem [shape: f32[2,8,8,32], index: 1, kind: input, shape index: {}, may-alias: {0,1,2}]   ;;  %s802_s2 = inlined_call_operand.vmem [shape: f32[2,8,8,32], index: 2, kind: input, shape index: {}, may-alias: {0,1,2}]   ;;  %s803_s3 = inlined_call_operand.vmem [shape: f32[32,2,8,32], index: 3, kind: output, shape index: {}]  }
   0x1   :  { %s721_s14 = smov 0   ;;  %s723_s15 = smov 0  }
   0x2   :  { %s725_s16 = smov 0  }
   0x3 LB: > { %s22_s17 = sadd.s32 1, %s687_s14  ;;  %s25_s18 = sadd.s32 1, %s691_s15  ;;  %s695_s16 = sphi %s725_s16, %s13_s16   ;;  %s691_s15 = sphi %s723_s15, %s807_s15   ;;  %s687_s14 = sphi %s721_s14, %s806_s14   ;;  %s683_s13 = sphi %s719_s13, %s805_s13   ;;  %s679_s12 = sphi %s717_s12, %s804_s12  }
   0x4   : > { %p23_p0 = scmp.ge.s32.totalorder %s22_s17, 8  ;;  %p567_p1 = scmp.ge.s32.totalorder %s695_s16, 1 }
   0x5   : > { %p244_p2 = scmp.lt.s32.totalorder %s695_s16, 17 }
   0x6   : > { %s809_s17 = smov (%p23_p0, %s22_s17), 0  ;;  %s811_s18 = smov (!%p23_p0, %s25_s18), %s691_s15 }
   0x7   : > { %p245_p3 = pnand %p567_p1, %p244_p2  ;;  %p27_p4 = scmp.ge.s32.totalorder %s811_s18, 2 }
   0x8   : > { %s304_s19 = sadd.s32 (!%p245_p3), 4294967295, %s679_s12  ;;  %p309_p5 = scmp.lt.s32.totalorder (!%p245_p3), %s683_s13, 1  ;;  %vm378_vm0 = vcmask (!%p245_p3), 1040384   ;;  %vm382_vm1 = vcmask (!%p245_p3), 1046528   ;;  %vm388_vm2 = vcmask (!%p245_p3), 261120  }
   0x9   : > { %s813_s18 = smov (%p27_p4, %s811_s18), 0  ;;  %248 = sbr.rel (%p245_p3) target bundleno = 46 (0x2e), region = 32 }
   0xa   : > { %p305_p6 = scmp.gt.s32.totalorder (!%p245_p3), %s304_s19, 0  ;;  %p568_p7 = scmp.lt.s32.totalorder (!%p245_p3), %s304_s19, 7 }
   0xb   : > { %p322_p8 = scmp.gt.s32.totalorder (!%p245_p3), %s679_s12, 0  ;;  %p575_p10 = scmp.lt.s32.totalorder (!%p245_p3), %s679_s12, 7 }
   0xc   : > { %s589_s23 = sshll.u32 (!%p245_p3), %s683_s13, 3  ;;  %s338_s30 = sadd.s32 (!%p245_p3), 1, %s679_s12 }
   0xd   : > { %s357_s25 = sadd.s32 (!%p245_p3), %s679_s12, %s589_s23  ;;  %p339_p12 = scmp.gt.s32.totalorder (!%p245_p3), %s338_s30, 0 }
   0xe   : > { %s590_s4 = sshll.u32 (!%p245_p3), %s357_s25, 1  ;;  %p582_p0 = scmp.lt.s32.totalorder (!%p245_p3), %s338_s30, 7 }
   0xf   : > { %p359_p13 = scmp.lt.s32.totalorder (!%p245_p3), %s590_s4, 31 }
  0x10   : > { %s310_s20 = scalar_select %p309_p5, %s683_s13, 1 }
  0x11   : > { %s815_s19 = smov (!%p305_p6, %s304_s19), 0  ;;  %s825_s30 = smov (!%p339_p12, %s338_s30), 0 }
  0x12   : > { %s817_s19 = smov (!%p568_p7, %s815_s19), 7  ;;  %s757_s22 = sshll.u32 %s310_s20, 3 }
  0x13   : > { %s323_s21 = scalar_select %p322_p8, %s679_s12, 0 }
  0x14   : > { %p311_p9 = scmp.lt.s32.totalorder %s817_s19, 7  ;;  %s827_s4 = smov (!%p359_p13, %s590_s4), 31 }
  0x15   : > { %s821_s21 = smov (!%p575_p10, %s323_s21), 7  ;;  %s829_s30 = smov (!%p582_p0, %s825_s30), 7 }
  0x16   : > { %s819_s19 = smov (!%p311_p9, %s817_s19), 7  ;;  %p328_p11 = scmp.lt.s32.totalorder %s821_s21, 7 }
  0x17   : > { %s314_s24 = sadd.s32 %s757_s22, %s819_s19  ;;  %p345_p1 = scmp.lt.s32.totalorder %s829_s30, 7 }
  0x18   : > { %s574_s26 = sshll.u32 %s314_s24, 3  ;;  %s823_s21 = smov (!%p328_p11, %s821_s21), 7 }
  0x19   : > { %s316_s29 = scalar_lea.vmem %s800_s0, %s574_s26  ;;  %s331_s5 = sadd.s32 %s757_s22, %s823_s21 }
  0x1a   : > { %v367_v0 = vld [vmem:[%s316_s29] sm:$0xff]  ;;  %s581_s6 = sshll.u32 %s331_s5, 3  ;;  %s616_s10 = sshll.u32 %s827_s4, 4 }
  0x1b   : > { %s333_s9 = scalar_lea.vmem %s801_s1, %s581_s6  ;;  %v370_v1 = vmul.f32 0.25, %v367_v0  ;;  %s831_s30 = smov (!%p345_p1, %s829_s30), 7 }
  0x1c   : > { %v368_v2 = vld [vmem:[%s333_s9] sm:$0xff]  ;;  %s348_s11 = sadd.s32 %s757_s22, %s831_s30  ;;  %s363_s19 = scalar_lea.vmem %s803_s3, %s616_s10 }
  0x1d   : > { %v371_v3 = vmul.f32 0.75, %v368_v2  ;;  %s588_s20 = sshll.u32 %s348_s11, 3 }
  0x1e   : > { %s350_s24 = scalar_lea.vmem %s802_s2, %s588_s20 }
  0x1f   : > { %v372_v4 = vadd.f32 %v371_v3, %v370_v1  ;;  %v369_v16 = vld [vmem:[%s350_s24] sm:$0xff] }
  0x20   : > { %v373_v17 = vmul.f32 0.25, %v369_v16 }
  0x21   : > { %v376_v5 = vrot.slane %v372_v4, 7  ;;  %v380_v6 = vrot.slane %v372_v4, 1  ;;  %v385_v7 = vmul.f32 0.75, %v372_v4 }
  0x22   : > { %v374_v18 = vadd.f32 %v373_v17, %v371_v3 }
  0x23   : > { %v379_v8 = vsel %vm378_vm0, %v372_v4, %v376_v5  ;;  %v383_v9 = vsel %vm382_vm1, %v380_v6, %v372_v4 }
  0x24   : > { %v384_v10 = vmul.f32 0.25, %v379_v8  ;;  %v390_v11 = vmul.f32 0.25, %v383_v9  ;;  %v396_v19 = vrot.slane %v374_v18, 7  ;;  %v399_v20 = vrot.slane %v374_v18, 1 }
  0x25   : > { %v403_v21 = vmul.f32 0.75, %v374_v18 }
  0x26   : > { %v386_v12 = vadd.f32 %v385_v7, %v384_v10  ;;  %v391_v13 = vadd.f32 %v390_v11, %v385_v7  ;;  %v398_v22 = vsel %vm378_vm0, %v374_v18, %v396_v19  ;;  %v401_v23 = vsel %vm382_vm1, %v399_v20, %v374_v18 }
  0x27   : > { %v402_v24 = vmul.f32 0.25, %v398_v22  ;;  %v408_v25 = vmul.f32 0.25, %v401_v23 }
  0x28   : > { %v387_v14 = vmax.f32 %v386_v12, 0.0  ;;  %v392_v15 = vmax.f32 %v391_v13, 0.0 }
  0x29   : > { %v404_v26 = vadd.f32 %v403_v21, %v402_v24  ;;  %v409_v27 = vadd.f32 %v408_v25, %v403_v21 }
  0x2a   : > { %389 = vst.msk [vmem:[%s363_s19] sm:$0xff] %vm388_vm2, %v387_v14  ;;  %593 = vst.msk [vmem:[%s363_s19 + $0x8] sm:$0xff] %vm388_vm2, %v392_v15 }
  0x2b   : > { %v405_v28 = vmax.f32 %v404_v26, 0.0  ;;  %v410_v29 = vmax.f32 %v409_v27, 0.0 }
  0x2d   : > { %594 = vst.msk [vmem:[%s363_s19 + $0x10] sm:$0xff] %vm388_vm2, %v405_v28  ;;  %595 = vst.msk [vmem:[%s363_s19 + $0x18] sm:$0xff] %vm388_vm2, %v410_v29 }
  0x2e PF: > { %s13_s16 = sadd.s32 1, %s695_s16   ;;  %s804_s12 = smov %s687_s14 }
  0x2f   : > { %p10_p2 = scmp.ge.s32.totalorder %s13_s16, 18   ;;  %s805_s13 = smov %s691_s15 }
  0x30   : > { %s806_s14 = smov %s809_s17  ;;  %s807_s15 = smov %s813_s18 }
  0x31   :  { %12 = sbr.rel (!%p10_p2) target bundleno = 3 (0x3), region = 71 }

// kernel: knetu_forward.2
= control target key start
LH: loop header
LB: loop body
LE: loop exit
PB: predicated region body
PF: predicated region fallthrough
CT: control target
= control target key end

     0   :  { %s5385_s21 = smov 0   ;;  %s5387_s22 = smov 0   ;;  %s6416_s0 = inlined_call_operand.vmem [shape: f32[20,10,10,8], index: 0, kind: input, shape index: {}, may-alias: {0,1,2}]   ;;  %s6417_s1 = inlined_call_operand.vmem [shape: f32[20,10,10,8], index: 1, kind: input, shape index: {}, may-alias: {0,1,2}]   ;;  %s6418_s2 = inlined_call_operand.vmem [shape: f32[20,10,10,8], index: 2, kind: input, shape index: {}, may-alias: {0,1,2}]   ;;  %s6419_s3 = inlined_call_operand.vmem [shape: f32[216,8], index: 3, kind: input, shape index: {}]   ;;  %s6420_s4 = inlined_call_operand.vmem [shape: f32[1,8], index: 4, kind: input, shape index: {}]   ;;  %s6421_s5 = inlined_call_operand.vmem [shape: f32[8,4], index: 5, kind: input, shape index: {}]   ;;  %s6422_s6 = inlined_call_operand.vmem [shape: f32[16,8,8,4], index: 6, kind: output, shape index: {}]  }
   0x1   :  { %s5389_s23 = smov 0   ;;  %s5391_s24 = smov 0  }
   0x2   :  { %s5393_s25 = smov 0  }
   0x3 LB: > { %s25_s26 = sadd.s32 1, %s5340_s23  ;;  %s28_s27 = sadd.s32 1, %s5344_s24  ;;  %s5348_s25 = sphi %s5393_s25, %s16_s25   ;;  %s5344_s24 = sphi %s5391_s24, %s6456_s24   ;;  %s5340_s23 = sphi %s5389_s23, %s6455_s23   ;;  %s5336_s22 = sphi %s5387_s22, %s6454_s22   ;;  %s5332_s21 = sphi %s5385_s21, %s6453_s21  }
   0x4   : > { %p26_p0 = scmp.ge.s32.totalorder %s25_s26, 8  ;;  %p4180_p1 = scmp.ge.s32.totalorder %s5348_s25, 1 }
   0x5   : > { %p280_p2 = scmp.lt.s32.totalorder %s5348_s25, 17 }
   0x6   : > { %s6458_s26 = smov (%p26_p0, %s25_s26), 0  ;;  %s6460_s27 = smov (!%p26_p0, %s28_s27), %s5344_s24 }
   0x7   : > { %p281_p3 = pnand %p4180_p1, %p280_p2  ;;  %p30_p4 = scmp.ge.s32.totalorder %s6460_s27, 2 }
   0x9   : > { %s6462_s27 = smov (%p30_p4, %s6460_s27), 0  ;;  %284 = sbr.rel (%p281_p3) target bundleno = 687 (0x2af), region = 44 }
  0x10   : > { %v432_v0 = vld [vmem:[%s6419_s3 + $0x8] sm:$0xff]  ;;  %s330_s8 = smul.u32 10, %s5336_s22  ;;  %v5429_v2 = vld [vmem:[%s6419_s3 + $0x70] sm:$0xff]  ;;  %v390_v3 = vld [vmem:[%s6419_s3] sm:$0xff]  ;;  %vm407_vm0 = vcmask 1046528   ;;  %vm433_vm1 = vcmask 64512  }
  0x11   : > { %v2138_v1 = vld [vmem:[%s6419_s3 + $0x68] sm:$0xff]  ;;  %4667 = vmatprep.subr.mxu1 %v432_v0  ;;  %v5488_v20 = vld [vmem:[%s6419_s3 + $0x10] sm:$0xff]  ;;  %v5506_v27 = vld [vmem:[%s6419_s3 + $0x78] sm:$0xff]  ;;  %vm676_vm2 = vcmask 1045504   ;;  %vm4068_vm3 = vcmask 31744  }
  0x12   : > { %4849 = vmatprep.subr.mxu0 %v2138_v1  ;;  %4668 = vmatpush3.msra.mxu1 %v432_v0  ;;  %s5435_s13 = sadd.s32 %s5332_s21, %s330_s8 }
  0x13   : > { %4850 = vmatpush3.msra.mxu0 %v2138_v1  ;;  %p332_p5 = scmp.lt.s32.totalorder %s5435_s13, 19  ;;  %s341_s14 = sadd.s32 1, %s5435_s13  ;;  %4681 = vmatprep.subr.mxu1 %v390_v3 }
  0x14   : > { %4863 = vmatprep.subr.mxu0 %v5429_v2  ;;  %p342_p6 = scmp.lt.s32.totalorder %s341_s14, 19 }
  0x15   : > { %s333_s15 = scalar_select %p332_p5, %s5435_s13, 19 }
  0x16   : > { %s6464_s14 = smov (!%p342_p6, %s341_s14), 19 }
  0x17   : > { %s5267_s16 = smul.u32 160, %s333_s15 }
  0x18   : > { %s5268_s17 = smul.u32 160, %s6464_s14 }
  0x19   : > { %s5444_s20 = scalar_lea.vmem %s6416_s0, %s5267_s16  ;;  %s352_s16 = sadd.s32 2, %s5435_s13 }
  0x1a   : > { %v5447_v4 = vld [vmem:[%s5444_s20] sm:$0xff]  ;;  %v5450_v5 = vld [vmem:[%s5444_s20 + $0x8] sm:$0x3]  ;;  %v5453_v6 = vld [vmem:[%s5444_s20 + $0x10] sm:$0xff]  ;;  %s5458_s30 = scalar_lea.vmem %s6417_s1, %s5268_s17  ;;  %p353_p7 = scmp.lt.s32.totalorder %s352_s16, 19 }
  0x1b   : > { %v408_v7 = vrot.slane %v5447_v4, 1  ;;  %v409_v8 = vrot.slane %v5450_v5, 1  ;;  %v5463_v9 = vld [vmem:[%s5444_s20 + $0x18] sm:$0x3]  ;;  %v411_v10 = vrot.slane %v5453_v6, 1  ;;  %v5468_v12 = vld [vmem:[%s5458_s30 + $0x10] sm:$0xff] }
  0x1c   : > { %v412_v11 = vrot.slane %v5463_v9, 1  ;;  %v5471_v13 = vld [vmem:[%s5458_s30 + $0x18] sm:$0x3]  ;;  %v5474_v14 = vld [vmem:[%s5458_s30 + $0x20] sm:$0xff]  ;;  %v1712_v16 = vrot.slane %v5468_v12, 1  ;;  %v5501_v26 = vld [vmem:[%s5444_s20 + $0x30] sm:$0xff] }
  0x1d   : > { %v410_v15 = vsel %vm407_vm0, %v408_v7, %v409_v8  ;;  %v1713_v17 = vrot.slane %v5471_v13, 1  ;;  %v5480_v18 = vld [vmem:[%s5458_s30 + $0x28] sm:$0x3]  ;;  %v5483_v19 = vld [vmem:[%s5444_s20 + $0x20] sm:$0xff]  ;;  %v1867_v22 = vrot.slane %v5471_v13, 2  ;;  %v1715_v23 = vrot.slane %v5474_v14, 1 }
  0x1e   : > { %4669 = vmatprep.mubr.msk.f32.mxu1 %vm433_vm1, %v410_v15  ;;  %v5492_v21 = vsel %vm407_vm0, %v411_v10, %v412_v11  ;;  %v1716_v24 = vrot.slane %v5480_v18, 1  ;;  %v5498_v25 = vld [vmem:[%s5444_s20 + $0x28] sm:$0x3]  ;;  %v414_v29 = vrot.slane %v5483_v19, 1  ;;  %v5516_v31 = vld [vmem:[%s5444_s20 + $0x38] sm:$0x3] }
  0x1f   : > { %4670 = vmatmul.mubr.msk.f32.vlgmr.msra.gmra.mrb[0].mxu1 %vm433_vm1, %v5492_v21  ;;  %v5511_v28 = vsel %vm407_vm0, %v1712_v16, %v1713_v17  ;;  %v415_v30 = vrot.slane %v5498_v25, 1  ;;  %v417_v32 = vrot.slane %v5501_v26, 1  ;;  %v5520_v33 = vld [vmem:[%s5458_s30 + $0x30] sm:$0xff]  ;;  %v418_v35 = vrot.slane %v5516_v31, 1  ;;  %v5529_v36 = vld [vmem:[%s5458_s30 + $0x38] sm:$0x3] }
  0x20   : > { %4851 = vmatprep.mubr.msk.f32.mxu0 %vm433_vm1, %v5511_v28  ;;  %v5525_v34 = vsel %vm407_vm0, %v1715_v23, %v1716_v24  ;;  %v1718_v37 = vrot.slane %v5520_v33, 1  ;;  %v5533_v38 = vld [vmem:[%s5458_s30 + $0x40] sm:$0xff]  ;;  %4682 = vmatpush3.msra.mxu1 %v390_v3  ;;  %v1719_v41 = vrot.slane %v5529_v36, 1  ;;  %v5545_v42 = vld [vmem:[%s5458_s30 + $0x48] sm:$0x3]  ;;  %v5562_v49 = vld [vmem:[%s5444_s20 + $0x50] sm:$0xff] }
  0x21   : > { %v5536_v39 = vld [vmem:[%s5444_s20 + $0x40] sm:$0xff]  ;;  %4852 = vmatmul.mubr.msk.f32.vlgmr.msra.gmra.mrb[0].mxu0 %vm433_vm1, %v5525_v34  ;;  %v5541_v40 = vsel %vm407_vm0, %v414_v29, %v415_v30  ;;  %v1721_v43 = vrot.slane %v5533_v38, 1  ;;  %v5549_v44 = vld [vmem:[%s5444_s20 + $0x48] sm:$0x3]  ;;  %4695 = vmatprep.subr.mxu1 %v5488_v20  ;;  %v5556_v45 = vsel %vm407_vm0, %v417_v32, %v418_v35  ;;  %v1722_v46 = vrot.slane %v5545_v42, 1  ;;  %v5575_v54 = vld [vmem:[%s5458_s30 + $0x50] sm:$0xff] }
  0x22   : > { %4864 = vmatpush3.msra.mxu0 %v5429_v2  ;;  %4672 = vmatprep.mubr.msk.f32.mxu1 %vm433_vm1, %v5541_v40  ;;  %v420_v47 = vrot.slane %v5536_v39, 1  ;;  %v421_v48 = vrot.slane %v5549_v44, 1  ;;  %v5565_v50 = vld [vmem:[%s5444_s20 + $0x58] sm:$0x3]  ;;  %v5570_v51 = vsel %vm407_vm0, %v1718_v37, %v1719_v41  ;;  %v423_v52 = vrot.slane %v5562_v49, 1  ;;  %v5581_v56 = vld [vmem:[%s5458_s30 + $0x60] sm:$0xff] }
  0x23   : > { %4673 = vmatmul.mubr.msk.f32.gmra.mrb[2].mxu1 %vm433_vm1, %v5556_v45  ;;  %v424_v53 = vrot.slane %v5565_v50, 1  ;;  %v5578_v55 = vld [vmem:[%s5458_s30 + $0x58] sm:$0x3]  ;;  %4877 = vmatprep.subr.mxu0 %v5506_v27  ;;  %v5587_v57 = vsel %vm407_vm0, %v1721_v43, %v1722_v46  ;;  %v1724_v59 = vrot.slane %v5575_v54, 1  ;;  %v5595_v61 = vld [vmem:[%s5458_s30 + $0x68] sm:$0x3] }
  0x24   : > { %4854 = vmatprep.mubr.msk.f32.mxu0 %vm433_vm1, %v5570_v51  ;;  %v5590_v58 = vsel %vm407_vm0, %v420_v47, %v421_v48  ;;  %v1725_v60 = vrot.slane %v5578_v55, 1  ;;  %v5598_v62 = vld [vmem:[%s5444_s20 + $0x60] sm:$0xff]  ;;  %v5601_v63 = vld [vmem:[%s5444_s20 + $0x70] sm:$0xff]  ;;  %v1727_v1 = vrot.slane %v5581_v56, 1  ;;  %v1728_v2 = vrot.slane %v5595_v61, 1  ;;  %s6466_s16 = smov (!%p353_p7, %s352_s16), 19 }
  0x25   : > { %4855 = vmatmul.mubr.msk.f32.gmra.mrb[2].mxu0 %vm433_vm1, %v5587_v57  ;;  %4675 = vmatprep.mubr.msk.f32.mxu1 %vm433_vm1, %v5590_v58  ;;  %v5608_v0 = vsel %vm407_vm0, %v423_v52, %v424_v53  ;;  %v5613_v3 = vld [vmem:[%s5444_s20 + $0x68] sm:$0x3]  ;;  %v426_v7 = vrot.slane %v5598_v62, 1  ;;  %v5617_v8 = vld [vmem:[%s5458_s30 + $0x70] sm:$0xff]  ;;  %v5624_v15 = vld [vmem:[%s5444_s20 + $0x78] sm:$0x3] }
  0x26   : > { %v5620_v10 = vsel %vm407_vm0, %v1724_v59, %v1725_v60  ;;  %v427_v11 = vrot.slane %v5613_v3, 1  ;;  %v429_v16 = vrot.slane %v5601_v63, 1  ;;  %v5628_v17 = vld [vmem:[%s5458_s30 + $0x78] sm:$0x3]  ;;  %v5635_v23 = vsel %vm407_vm0, %v1727_v1, %v1728_v2  ;;  %v5641_v32 = vld [vmem:[%s5458_s30 + $0x80] sm:$0xff]  ;;  %s5269_s18 = smul.u32 160, %s6466_s16 }
  0x27   : > { %4676 = vmatmul.mubr.msk.f32.gmra.mrb[4].mxu1 %vm433_vm1, %v5608_v0  ;;  %4857 = vmatprep.mubr.msk.f32.mxu0 %vm433_vm1, %v5620_v10  ;;  %v430_v24 = vrot.slane %v5624_v15, 1  ;;  %v1730_v29 = vrot.slane %v5617_v8, 1  ;;  %v1731_v30 = vrot.slane %v5628_v17, 1  ;;  %6433 = vst [vmem:[#allocation2_spill] sm:$0xff] %v5641_v32  ;;  %v5644_v35 = vld [vmem:[%s5458_s30 + $0x88] sm:$0x3] }
  0x28   : > { %v5647_v37 = vsel %vm407_vm0, %v426_v7, %v427_v11  ;;  %v2135_v41 = vrot.slane %v5641_v32, 1  ;;  %v2136_v43 = vrot.slane %v5644_v35, 1  ;;  %v1866_v46 = vrot.slane %v5468_v12, 2  ;;  %s5799_s8 = scalar_lea.vmem %s6418_s2, %s5269_s18  ;;  %s4184_s16 = sshll.u32 %s5336_s22, 3 }
  0x29   : > { %4858 = vmatmul.mubr.msk.f32.gmra.mrb[4].mxu0 %vm433_vm1, %v5635_v23  ;;  %4678 = vmatprep.mubr.msk.f32.mxu1 %vm433_vm1, %v5647_v37  ;;  %v5657_v47 = vsel %vm407_vm0, %v429_v16, %v430_v24  ;;  %v5660_v48 = vsel %vm407_vm0, %v1730_v29, %v1731_v30  ;;  %v1870_v52 = vrot.slane %v5480_v18, 2  ;;  %v1869_v59 = vrot.slane %v5474_v14, 2  ;;  %s362_s13 = sadd.s32 %s5332_s21, %s4184_s16 }
  0x2a   : > { %6434 = vst [vmem:[#allocation3_spill] sm:$0xff] %v5660_v48  ;;  %4860 = vmatprep.mubr.msk.f32.mxu0 %vm433_vm1, %v5660_v48  ;;  %v5666_v53 = vsel %vm407_vm0, %v2135_v41, %v2136_v43  ;;  %v5674_v60 = vsel %vm676_vm2, %v1866_v46, %v1867_v22  ;;  %v1872_v1 = vrot.slane %v5520_v33, 2  ;;  %v1873_v18 = vrot.slane %v5529_v36, 2  ;;  %v831_v36 = vld [vmem:[%s6419_s3 + $0x18] sm:$0xff]  ;;  %p363_p8 = scmp.lt.s32.totalorder %s362_s13, 15 }
  0x2b   : > { %4679 = vmatmul.mubr.msk.f32.gmra.mrb[6].mxu1 %vm433_vm1, %v5657_v47  ;;  %6435 = vst [vmem:[#allocation4_spill] sm:$0xff] %v5674_v60  ;;  %v5685_v2 = vsel %vm676_vm2, %v1869_v59, %v1870_v52  ;;  %v1875_v13 = vrot.slane %v5533_v38, 2  ;;  %v1876_v22 = vrot.slane %v5545_v42, 2  ;;  %v1878_v11 = vrot.slane %v5575_v54, 2  ;;  %v2494_v42 = vld [vmem:[%s6419_s3 + $0x80] sm:$0xff] }
  0x2c   : > { %4683 = vmatprep.mubr.msk.f32.mxu1 %vm433_vm1, %v5447_v4  ;;  %6436 = vst [vmem:[#allocation5_spill] sm:$0xff] %v5685_v2  ;;  %v5695_v7 = vsel %vm676_vm2, %v1872_v1, %v1873_v18  ;;  %v1879_v16 = vrot.slane %v5578_v55, 2  ;;  %v1881_v24 = vrot.slane %v5581_v56, 2  ;;  %v1884_v30 = vrot.slane %v5617_v8, 2  ;;  %s6468_s13 = smov (!%p363_p8, %s362_s13), 15 }
  0x2d   : > { %4861 = vmatmul.mubr.msk.f32.gmra.mrb[6].mxu0 %vm433_vm1, %v5666_v53  ;;  %6437 = vst [vmem:[#allocation6_spill] sm:$0xff] %v5695_v7  ;;  %v5711_v55 = vsel %vm676_vm2, %v1875_v13, %v1876_v22  ;;  %v678_v41 = vrot.slane %v5450_v5, 2  ;;  %v2255_v46 = vrot.slane %v5644_v35, 2  ;;  %v681_v52 = vrot.slane %v5463_v9, 2  ;;  %s4414_s17 = sshll.u32 %s6468_s13, 6 }
  0x2e   : > { %4865 = vmatprep.mubr.msk.f32.mxu0 %vm433_vm1, %v5674_v60  ;;  %6438 = vst [vmem:[#allocation7_spill] sm:$0xff] %v5711_v55  ;;  %v5718_v29 = vsel %vm676_vm2, %v1878_v11, %v1879_v16  ;;  %v683_v35 = vrot.slane %v5483_v19, 2  ;;  %v684_v1 = vrot.slane %v5498_v25, 2  ;;  %v686_v13 = vrot.slane %v5501_v26, 2  ;;  %s367_s28 = scalar_lea.vmem %s6422_s6, %s4414_s17 }
  0x2f   : > { %4684 = vmatmul.mubr.msk.f32.vlgmr.msra.gmra.mrb[0].mxu1 %vm433_vm1, %v5453_v6  ;;  %6439 = vst [vmem:[#allocation8_spill] sm:$0xff] %v5718_v29  ;;  %v687_v22 = vrot.slane %v5516_v31, 2  ;;  %v689_v11 = vrot.slane %v5536_v39, 2  ;;  %v690_v16 = vrot.slane %v5549_v44, 2  ;;  %v693_v44 = vrot.slane %v5565_v50, 2  ;;  %v5804_v50 = vld [vmem:[%s5799_s8 + $0x80] sm:$0xff] }
  0x30   : > { %4686 = vmatprep.mubr.msk.f32.mxu1 %vm433_vm1, %v5483_v19  ;;  %4696 = vmatpush3.msra.mxu1 %v5488_v20  ;;  %v1882_v20 = vrot.slane %v5595_v61, 2  ;;  %v677_v61 = vrot.slane %v5447_v4, 2  ;;  %v680_v4 = vrot.slane %v5453_v6, 2  ;;  %v5766_v25 = vsel %vm676_vm2, %v683_v35, %v684_v1  ;;  %v1561_v1 = vld [vmem:[%s5458_s30 + $0x90] sm:$0xff] }
  0x31   : > { %4866 = vmatmul.mubr.msk.f32.vlgmr.msra.gmra.mrb[0].mxu0 %vm433_vm1, %v5685_v2  ;;  %4709 = vmatprep.subr.mxu1 %v831_v36  ;;  %v5780_v31 = vsel %vm676_vm2, %v686_v13, %v687_v22 }
  0x32   : > { %4878 = vmatpush3.msra.mxu0 %v5506_v27  ;;  %4868 = vmatprep.mubr.msk.f32.mxu0 %vm433_vm1, %v5695_v7  ;;  %v1885_v27 = vrot.slane %v5628_v17, 2  ;;  %v5732_v43 = vsel %vm676_vm2, %v1881_v24, %v1882_v20  ;;  %v2254_v17 = vrot.slane %v5641_v32, 2  ;;  %v679_v59 = vsel %vm676_vm2, %v677_v61, %v678_v41  ;;  %v952_v24 = vld [vmem:[%s6419_s3 + $0x20] sm:$0xff] }
  0x33   : > { %4687 = vmatmul.mubr.msk.f32.gmra.mrb[2].mxu1 %vm433_vm1, %v5501_v26  ;;  %4891 = vmatprep.subr.mxu0 %v2494_v42  ;;  %6440 = vst [vmem:[#allocation9_spill] sm:$0xff] %v5732_v43  ;;  %v5759_v9 = vsel %vm676_vm2, %v680_v4, %v681_v52  ;;  %v692_v20 = vrot.slane %v5562_v49, 2  ;;  %v695_v41 = vrot.slane %v5598_v62, 2  ;;  %v696_v61 = vrot.slane %v5613_v3, 2 }
  0x34   : > { %4689 = vmatprep.mubr.msk.f32.mxu1 %vm433_vm1, %v5536_v39  ;;  %v5739_v5 = vsel %vm676_vm2, %v1884_v30, %v1885_v27  ;;  %v5753_v18 = vsel %vm676_vm2, %v2254_v17, %v2255_v46  ;;  %v2613_v30 = vld [vmem:[%s6419_s3 + $0x88] sm:$0xff]  ;;  %v5790_v27 = vsel %vm676_vm2, %v689_v11, %v690_v16  ;;  %v699_v17 = vrot.slane %v5624_v15, 2  ;;  %v1562_v16 = vld [vmem:[%s5458_s30 + $0x98] sm:$0x3] }
  0x35   : > { %4869 = vmatmul.mubr.msk.f32.gmra.mrb[2].mxu0 %vm433_vm1, %v5711_v55  ;;  %6441 = vst [vmem:[#allocation10_spill] sm:$0xff] %v5739_v5  ;;  %v5810_v3 = vsel %vm676_vm2, %v692_v20, %v693_v44  ;;  %v3321_v46 = vrot.slane %v5804_v50, 1  ;;  %v5818_v52 = vsel %vm676_vm2, %v695_v41, %v696_v61  ;;  %v1071_v11 = vld [vmem:[%s6419_s3 + $0x28] sm:$0xff]  ;;  %v2492_v20 = vrot.slane %v1562_v16, 1  ;;  %v5876_v44 = vld [vmem:[%s5444_s20 + $0x80] sm:$0xff]  ;;  %v1187_v41 = vld [vmem:[%s6419_s3 + $0x30] sm:$0xff] }
  0x36   : > { %4871 = vmatprep.mubr.msk.f32.mxu0 %vm433_vm1, %v5718_v29  ;;  %v949_v61 = vrot.slane %v5876_v44, 1 }
  0x37   : > { %4690 = vmatmul.mubr.msk.f32.gmra.mrb[4].mxu1 %vm433_vm1, %v5562_v49 }
  0x38   : > { %4692 = vmatprep.mubr.msk.f32.mxu1 %vm433_vm1, %v5598_v62 }
  0x39   : > { %4872 = vmatmul.mubr.msk.f32.gmra.mrb[4].mxu0 %vm433_vm1, %v5732_v43 }
  0x3a   : > { %4874 = vmatprep.mubr.msk.f32.mxu0 %vm433_vm1, %v5739_v5 }
  0x3b   : > { %4693 = vmatmul.mubr.msk.f32.gmra.mrb[6].mxu1 %vm433_vm1, %v5601_v63 }
  0x3c   : > { %4697 = vmatprep.mubr.msk.f32.mxu1 %vm433_vm1, %v679_v59  ;;  %v3440_v59 = vrot.slane %v5804_v50, 2 }
  0x3d   : > { %4875 = vmatmul.mubr.msk.f32.gmra.mrb[6].mxu0 %vm433_vm1, %v5753_v18 }
  0x3e   : > { %4879 = vmatprep.mubr.msk.f32.mxu0 %vm433_vm1, %v5474_v14 }
  0x3f   : > { %4698 = vmatmul.mubr.msk.f32.vlgmr.msra.gmra.mrb[0].mxu1 %vm433_vm1, %v5759_v9 }
  0x40   : > { %4700 = vmatprep.mubr.msk.f32.mxu1 %vm433_vm1, %v5766_v25  ;;  %4710 = vmatpush3.msra.mxu1 %v831_v36  ;;  %v2746_v36 = vld [vmem:[%s5799_s8 + $0x88] sm:$0x3] }
  0x41   : > { %4880 = vmatmul.mubr.msk.f32.vlgmr.msra.gmra.mrb[0].mxu0 %vm433_vm1, %v5520_v33  ;;  %4723 = vmatprep.subr.mxu1 %v952_v24  ;;  %v3322_v4 = vrot.slane %v2746_v36, 1  ;;  %v3441_v13 = vrot.slane %v2746_v36, 2 }
  0x42   : > { %4892 = vmatpush3.msra.mxu0 %v2494_v42  ;;  %4882 = vmatprep.mubr.msk.f32.mxu0 %vm433_vm1, %v5533_v38  ;;  %v698_v42 = vrot.slane %v5601_v63, 2 }
  0x43   : > { %4701 = vmatmul.mubr.msk.f32.gmra.mrb[2].mxu1 %vm433_vm1, %v5780_v31  ;;  %4905 = vmatprep.subr.mxu0 %v2613_v30  ;;  %v5831_v35 = vsel %vm407_vm0, %v3321_v46, %v3322_v4  ;;  %v5843_v22 = vsel %vm676_vm2, %v3440_v59, %v3441_v13  ;;  %v5929_v59 = vld [vmem:[%s5799_s8] sm:$0xff] }
  0x44   : > { %4703 = vmatprep.mubr.msk.f32.mxu1 %vm433_vm1, %v5790_v27  ;;  %v5827_v15 = vsel %vm676_vm2, %v698_v42, %v699_v17  ;;  %6442 = vst [vmem:[#allocation11_spill] sm:$0xff] %v5843_v22  ;;  %v2610_v42 = vrot.slane %v1561_v1, 2  ;;  %v2611_v17 = vrot.slane %v1562_v16, 2  ;;  %v5945_v13 = vld [vmem:[%s5799_s8 + $0x20] sm:$0xff]  ;;  %v1068_v16 = vrot.slane %v5876_v44, 2 }
  0x45   : > { %4883 = vmatmul.mubr.msk.f32.gmra.mrb[2].mxu0 %vm433_vm1, %v5575_v54  ;;  %v6063_v22 = vld [vmem:[%s5799_s8 + $0x78] sm:$0x3] }
  0x46   : > { %4885 = vmatprep.mubr.msk.f32.mxu0 %vm433_vm1, %v5581_v56  ;;  %v2612_v4 = vsel %vm676_vm2, %v2610_v42, %v2611_v17  ;;  %v5993_v42 = vld [vmem:[%s5799_s8 + $0x28] sm:$0x3] }
  0x47   : > { %4704 = vmatmul.mubr.msk.f32.gmra.mrb[4].mxu1 %vm433_vm1, %v5810_v3 }
  0x48   : > { %4706 = vmatprep.mubr.msk.f32.mxu1 %vm433_vm1, %v5818_v52 }
  0x49   : > { %4886 = vmatmul.mubr.msk.f32.gmra.mrb[4].mxu0 %vm433_vm1, %v5617_v8 }
  0x4a   : > { %4888 = vmatprep.mubr.msk.f32.mxu0 %vm433_vm1, %v5641_v32 }
  0x4b   : > { %4707 = vmatmul.mubr.msk.f32.gmra.mrb[6].mxu1 %vm433_vm1, %v5827_v15 }
  0x4c   : > { %4711 = vmatprep.mubr.msk.f32.mxu1 %vm433_vm1, %v5453_v6  ;;  %v2749_v6 = vld [vmem:[%s6419_s3 + $0x90] sm:$0xff] }
  0x4d   : > { %4889 = vmatmul.mubr.msk.f32.gmra.mrb[6].mxu0 %vm433_vm1, %v1561_v1 }
  0x4e   : > { %4893 = vmatprep.mubr.msk.f32.mxu0 %vm433_vm1, %v5525_v34 }
  0x4f   : > { %4712 = vmatmul.mubr.msk.f32.vlgmr.msra.gmra.mrb[0].mxu1 %vm433_vm1, %v5483_v19 }
  0x50   : > { %4714 = vmatprep.mubr.msk.f32.mxu1 %vm433_vm1, %v5501_v26  ;;  %4724 = vmatpush3.msra.mxu1 %v952_v24  ;;  %v2491_v24 = vrot.slane %v1561_v1, 1  ;;  %v5937_v1 = vld [vmem:[%s5799_s8 + $0x10] sm:$0xff] }
  0x51   : > { %4894 = vmatmul.mubr.msk.f32.vlgmr.msra.gmra.mrb[0].mxu0 %vm433_vm1, %v5570_v51  ;;  %4737 = vmatprep.subr.mxu1 %v1071_v11  ;;  %v2898_v17 = vrot.slane %v5937_v1, 1 }
  0x52   : > { %4906 = vmatpush3.msra.mxu0 %v2613_v30  ;;  %4896 = vmatprep.mubr.msk.f32.mxu0 %vm433_vm1, %v5587_v57  ;;  %v2493_v30 = vsel %vm407_vm0, %v2491_v24, %v2492_v20  ;;  %v5968_v20 = vld [vmem:[%s5799_s8 + $0x8] sm:$0x3] }
  0x53   : > { %4715 = vmatmul.mubr.msk.f32.gmra.mrb[2].mxu1 %vm433_vm1, %v5536_v39  ;;  %4919 = vmatprep.subr.mxu0 %v2749_v6 }
  0x54   : > { %4717 = vmatprep.mubr.msk.f32.mxu1 %vm433_vm1, %v5562_v49 }
  0x55   : > { %4897 = vmatmul.mubr.msk.f32.gmra.mrb[2].mxu0 %vm433_vm1, %v5620_v10 }
  0x56   : > { %4899 = vmatprep.mubr.msk.f32.mxu0 %vm433_vm1, %v5635_v23 }
  0x57   : > { %4718 = vmatmul.mubr.msk.f32.gmra.mrb[4].mxu1 %vm433_vm1, %v5598_v62 }
  0x58   : > { %4720 = vmatprep.mubr.msk.f32.mxu1 %vm433_vm1, %v5601_v63 }
  0x59   : > { %4900 = vmatmul.mubr.msk.f32.gmra.mrb[4].mxu0 %vm433_vm1, %v5660_v48  ;;  %v6086_v48 = vld [vmem:[%s5444_s20 + $0x90] sm:$0xff] }
  0x5a   : > { %4902 = vmatprep.mubr.msk.f32.mxu0 %vm433_vm1, %v5666_v53  ;;  %v387_v53 = vld [vmem:[%s5444_s20 + $0x88] sm:$0x3] }
  0x5b   : > { %4721 = vmatmul.mubr.msk.f32.gmra.mrb[6].mxu1 %vm433_vm1, %v5876_v44  ;;  %v950_v36 = vrot.slane %v387_v53, 1  ;;  %v1069_v24 = vrot.slane %v387_v53, 2  ;;  %v2896_v53 = vrot.slane %v5968_v20, 1 }
  0x5c   : > { %4725 = vmatprep.mubr.msk.f32.mxu1 %vm433_vm1, %v5492_v21  ;;  %v2919_v21 = vld [vmem:[%s6419_s3 + $0x98] sm:$0xff] }
  0x5d   : > { %4903 = vmatmul.mubr.msk.f32.gmra.mrb[6].mxu0 %vm433_vm1, %v2493_v30  ;;  %v5919_v46 = vsel %vm407_vm0, %v949_v61, %v950_v36  ;;  %v5975_v30 = vld [vmem:[%s5799_s8 + $0x50] sm:$0xff]  ;;  %v5985_v61 = vld [vmem:[%s5799_s8 + $0x18] sm:$0x3]  ;;  %v5990_v36 = vsel %vm676_vm2, %v1068_v16, %v1069_v24  ;;  %v2901_v24 = vrot.slane %v5945_v13, 1 }
  0x5e   : > { %4907 = vmatprep.mubr.msk.f32.mxu0 %vm433_vm1, %v5685_v2  ;;  %v2899_v32 = vrot.slane %v5985_v61, 1 }
  0x5f   : > { %4726 = vmatmul.mubr.msk.f32.vlgmr.msra.gmra.mrb[0].mxu1 %vm433_vm1, %v5541_v40 }
  0x60   : > { %4728 = vmatprep.mubr.msk.f32.mxu1 %vm433_vm1, %v5556_v45  ;;  %4738 = vmatpush3.msra.mxu1 %v1071_v11  ;;  %v5957_v11 = vld [vmem:[%s5799_s8 + $0x30] sm:$0xff] }
  0x61   : > { %4908 = vmatmul.mubr.msk.f32.vlgmr.msra.gmra.mrb[0].mxu0 %vm433_vm1, %v5695_v7  ;;  %4751 = vmatprep.subr.mxu1 %v1187_v41  ;;  %v1427_v7 = vld [vmem:[%s6419_s3 + $0x40] sm:$0xff] }
  0x62   : > { %4920 = vmatpush3.msra.mxu0 %v2749_v6  ;;  %4910 = vmatprep.mubr.msk.f32.mxu0 %vm433_vm1, %v5711_v55  ;;  %v5962_v6 = vld [vmem:[%s5799_s8 + $0x40] sm:$0xff] }
  0x63   : > { %4729 = vmatmul.mubr.msk.f32.gmra.mrb[2].mxu1 %vm433_vm1, %v5590_v58  ;;  %4933 = vmatprep.subr.mxu0 %v2919_v21  ;;  %v2907_v2 = vrot.slane %v5962_v6, 1 }
  0x64   : > { %4731 = vmatprep.mubr.msk.f32.mxu1 %vm433_vm1, %v5608_v0 }
  0x65   : > { %4911 = vmatmul.mubr.msk.f32.gmra.mrb[2].mxu0 %vm433_vm1, %v5718_v29  ;;  %v6015_v29 = vld [vmem:[%s5799_s8 + $0x48] sm:$0x3] }
  0x66   : > { %4913 = vmatprep.mubr.msk.f32.mxu0 %vm433_vm1, %v5732_v43  ;;  %v6010_v43 = vld [vmem:[%s5799_s8 + $0x38] sm:$0x3] }
  0x67   : > { %4732 = vmatmul.mubr.msk.f32.gmra.mrb[4].mxu1 %vm433_vm1, %v5647_v37  ;;  %v2905_v55 = vrot.slane %v6010_v43, 1 }
  0x68   : > { %4734 = vmatprep.mubr.msk.f32.mxu1 %vm433_vm1, %v5657_v47 }
  0x69   : > { %4914 = vmatmul.mubr.msk.f32.gmra.mrb[4].mxu0 %vm433_vm1, %v5739_v5  ;;  %v2902_v5 = vrot.slane %v5993_v42, 1 }
  0x6a   : > { %4916 = vmatprep.mubr.msk.f32.mxu0 %vm433_vm1, %v5753_v18  ;;  %v1308_v18 = vld [vmem:[%s6419_s3 + $0x38] sm:$0xff] }
  0x6b   : > { %4735 = vmatmul.mubr.msk.f32.gmra.mrb[6].mxu1 %vm433_vm1, %v5919_v46 }
  0x6c   : > { %4739 = vmatprep.mubr.msk.f32.mxu1 %vm433_vm1, %v5759_v9  ;;  %v3073_v9 = vld [vmem:[%s6419_s3 + $0xa0] sm:$0xff] }
  0x6d   : > { %4917 = vmatmul.mubr.msk.f32.gmra.mrb[6].mxu0 %vm433_vm1, %v2612_v4  ;;  %v6001_v4 = vld [vmem:[%s5799_s8 + $0x70] sm:$0xff] }
  0x6e   : > { %4921 = vmatprep.mubr.msk.f32.mxu0 %vm433_vm1, %v5929_v59 }
  0x6f   : > { %4740 = vmatmul.mubr.msk.f32.vlgmr.msra.gmra.mrb[0].mxu1 %vm433_vm1, %v5766_v25 }
  0x70   : > { %4742 = vmatprep.mubr.msk.f32.mxu1 %vm433_vm1, %v5780_v31  ;;  %4752 = vmatpush3.msra.mxu1 %v1187_v41  ;;  %v2895_v41 = vrot.slane %v5929_v59, 1 }
  0x71   : > { %4922 = vmatmul.mubr.msk.f32.vlgmr.msra.gmra.mrb[0].mxu0 %vm433_vm1, %v5937_v1  ;;  %4765 = vmatprep.subr.mxu1 %v1308_v18 }
  0x72   : > { %4934 = vmatpush3.msra.mxu0 %v2919_v21  ;;  %4924 = vmatprep.mubr.msk.f32.mxu0 %vm433_vm1, %v5945_v13  ;;  %v5981_v21 = vld [vmem:[%s5799_s8 + $0x60] sm:$0xff]  ;;  %v2897_v16 = vsel %vm407_vm0, %v2895_v41, %v2896_v53  ;;  %v6021_v41 = vsel %vm407_vm0, %v2898_v17, %v2899_v32  ;;  %v2904_v53 = vrot.slane %v5957_v11, 1  ;;  %v6036_v32 = vld [vmem:[%s5799_s8 + $0x58] sm:$0x3]  ;;  %v6041_v17 = vld [vmem:[%s5799_s8 + $0x68] sm:$0x3] }
  0x73   : > { %4743 = vmatmul.mubr.msk.f32.gmra.mrb[2].mxu1 %vm433_vm1, %v5790_v27  ;;  %4947 = vmatprep.subr.mxu0 %v3073_v9  ;;  %v2913_v60 = vrot.slane %v5981_v21, 1 }
  0x74   : > { %4745 = vmatprep.mubr.msk.f32.mxu1 %vm433_vm1, %v5810_v3 }
  0x75   : > { %4925 = vmatmul.mubr.msk.f32.gmra.mrb[2].mxu0 %vm433_vm1, %v5957_v11 }
  0x76   : > { %4927 = vmatprep.mubr.msk.f32.mxu0 %vm433_vm1, %v5962_v6 }
  0x77   : > { %4746 = vmatmul.mubr.msk.f32.gmra.mrb[4].mxu1 %vm433_vm1, %v5818_v52 }
  0x78   : > { %4748 = vmatprep.mubr.msk.f32.mxu1 %vm433_vm1, %v5827_v15 }
  0x79   : > { %4928 = vmatmul.mubr.msk.f32.gmra.mrb[4].mxu0 %vm433_vm1, %v5975_v30 }
  0x7a   : > { %4930 = vmatprep.mubr.msk.f32.mxu0 %vm433_vm1, %v5981_v21 }
  0x7b   : > { %4749 = vmatmul.mubr.msk.f32.gmra.mrb[6].mxu1 %vm433_vm1, %v5990_v36 }
  0x7c   : > { %4753 = vmatprep.mubr.msk.f32.mxu1 %vm433_vm1, %v5483_v19  ;;  %v6031_v19 = vsel %vm407_vm0, %v2901_v24, %v2902_v5  ;;  %v6051_v5 = vsel %vm407_vm0, %v2904_v53, %v2905_v55  ;;  %v2911_v24 = vrot.slane %v6036_v32, 1  ;;  %v2917_v55 = vrot.slane %v6063_v22, 1 }
  0x7d   : > { %4931 = vmatmul.mubr.msk.f32.gmra.mrb[6].mxu0 %vm433_vm1, %v6001_v4  ;;  %v3049_v53 = vrot.slane %v5929_v59, 2  ;;  %v3055_v59 = vrot.slane %v5945_v13, 2 }
  0x7e   : > { %4935 = vmatprep.mubr.msk.f32.mxu0 %vm433_vm1, %v2897_v16  ;;  %v2908_v16 = vrot.slane %v6015_v29, 1 }
  0x7f   : > { %4754 = vmatmul.mubr.msk.f32.vlgmr.msra.gmra.mrb[0].mxu1 %vm433_vm1, %v5501_v26  ;;  %v3203_v26 = vld [vmem:[%s6419_s3 + $0xa8] sm:$0xff] }
  0x80   : > { %4756 = vmatprep.mubr.msk.f32.mxu1 %vm433_vm1, %v5536_v39  ;;  %4766 = vmatpush3.msra.mxu1 %v1308_v18  ;;  %v2910_v39 = vrot.slane %v5975_v30, 1  ;;  %v6058_v18 = vsel %vm407_vm0, %v2907_v2, %v2908_v16  ;;  %v2916_v2 = vrot.slane %v6001_v4, 1  ;;  %v3050_v16 = vrot.slane %v5968_v20, 2 }
  0x81   : > { %4936 = vmatmul.mubr.msk.f32.vlgmr.msra.gmra.mrb[0].mxu0 %vm433_vm1, %v6021_v41  ;;  %4779 = vmatprep.subr.mxu1 %v1427_v7  ;;  %v3056_v20 = vrot.slane %v5993_v42, 2  ;;  %v1563_v42 = vld [vmem:[%s6419_s3 + $0x48] sm:$0xff] }
  0x82   : > { %4948 = vmatpush3.msra.mxu0 %v3073_v9  ;;  %4938 = vmatprep.mubr.msk.f32.mxu0 %vm433_vm1, %v6031_v19  ;;  %v2914_v9 = vrot.slane %v6041_v17, 1 }
  0x83   : > { %4757 = vmatmul.mubr.msk.f32.gmra.mrb[2].mxu1 %vm433_vm1, %v5562_v49  ;;  %4961 = vmatprep.subr.mxu0 %v3203_v26  ;;  %v6072_v49 = vsel %vm407_vm0, %v2910_v39, %v2911_v24  ;;  %v3052_v39 = vrot.slane %v5937_v1, 2  ;;  %v3058_v24 = vrot.slane %v5957_v11, 2 }
  0x84   : > { %4759 = vmatprep.mubr.msk.f32.mxu1 %vm433_vm1, %v5598_v62  ;;  %v6080_v62 = vsel %vm407_vm0, %v2913_v60, %v2914_v9  ;;  %v3053_v60 = vrot.slane %v5985_v61, 2  ;;  %v3059_v9 = vrot.slane %v6010_v43, 2  ;;  %v3324_v43 = vld [vmem:[%s6419_s3 + $0xb0] sm:$0xff] }
  0x85   : > { %4939 = vmatmul.mubr.msk.f32.gmra.mrb[2].mxu0 %vm433_vm1, %v6051_v5 }
  0x86   : > { %4941 = vmatprep.mubr.msk.f32.mxu0 %vm433_vm1, %v6058_v18  ;;  %v6108_v61 = vsel %vm676_vm2, %v3052_v39, %v3053_v60  ;;  %v1305_v39 = vrot.slane %v6086_v48, 1 }
  0x87   : > { %4760 = vmatmul.mubr.msk.f32.gmra.mrb[4].mxu1 %vm433_vm1, %v5601_v63  ;;  %v6094_v63 = vsel %vm407_vm0, %v2916_v2, %v2917_v55  ;;  %v3061_v2 = vrot.slane %v5962_v6, 2  ;;  %v3062_v55 = vrot.slane %v6015_v29, 2  ;;  %v3064_v29 = vrot.slane %v5975_v30, 2 }
  0x88   : > { %4762 = vmatprep.mubr.msk.f32.mxu1 %vm433_vm1, %v5876_v44  ;;  %v3051_v44 = vsel %vm676_vm2, %v3049_v53, %v3050_v16  ;;  %v389_v53 = vld [vmem:[%s5444_s20 + $0x98] sm:$0x3]  ;;  %v3067_v16 = vrot.slane %v5981_v21, 2 }
  0x89   : > { %4942 = vmatmul.mubr.msk.f32.gmra.mrb[4].mxu0 %vm433_vm1, %v6072_v49  ;;  %v1306_v60 = vrot.slane %v389_v53, 1 }
  0x8a   : > { %4944 = vmatprep.mubr.msk.f32.mxu0 %vm433_vm1, %v6080_v62 }
  0x8b   : > { %4763 = vmatmul.mubr.msk.f32.gmra.mrb[6].mxu1 %vm433_vm1, %v6086_v48 }
  0x8c   : > { %4767 = vmatprep.mubr.msk.f32.mxu1 %vm433_vm1, %v5541_v40  ;;  %v6118_v40 = vsel %vm676_vm2, %v3055_v59, %v3056_v20  ;;  %v3680_v20 = vld [vmem:[%s6419_s3 + $0xc8] sm:$0xff] }
  0x8d   : > { %4945 = vmatmul.mubr.msk.f32.gmra.mrb[6].mxu0 %vm433_vm1, %v6094_v63 }
  0x8e   : > { %4949 = vmatprep.mubr.msk.f32.mxu0 %vm433_vm1, %v3051_v44 }
  0x8f   : > { %4768 = vmatmul.mubr.msk.f32.vlgmr.msra.gmra.mrb[0].mxu1 %vm433_vm1, %v5556_v45  ;;  %v6133_v45 = vsel %vm676_vm2, %v3058_v24, %v3059_v9  ;;  %v3799_v24 = vld [vmem:[%s6419_s3 + $0xd0] sm:$0xff]  ;;  %v6448_v9 = vld [vmem:[#allocation7_spill] sm:$0xff] }
  0x90   : > { %4770 = vmatprep.mubr.msk.f32.mxu1 %vm433_vm1, %v5590_v58  ;;  %4780 = vmatpush3.msra.mxu1 %v1427_v7  ;;  %v3065_v58 = vrot.slane %v6036_v32, 2  ;;  %v6140_v7 = vsel %vm676_vm2, %v3061_v2, %v3062_v55  ;;  %v3070_v32 = vrot.slane %v6001_v4, 2  ;;  %v6451_v2 = vld [vmem:[#allocation10_spill] sm:$0xff] }
  0x91   : > { %4950 = vmatmul.mubr.msk.f32.vlgmr.msra.gmra.mrb[0].mxu0 %vm433_vm1, %v6108_v61  ;;  %4793 = vmatprep.subr.mxu1 %v1563_v42 }
  0x92   : > { %4962 = vmatpush3.msra.mxu0 %v3203_v26  ;;  %4952 = vmatprep.mubr.msk.f32.mxu0 %vm433_vm1, %v6118_v40  ;;  %v3068_v26 = vrot.slane %v6041_v17, 2  ;;  %v3071_v17 = vrot.slane %v6063_v22, 2  ;;  %v1544_v22 = vld [vmem:[%s5458_s30 + $0x8] sm:$0x3] }
  0x93   : > { %4771 = vmatmul.mubr.msk.f32.gmra.mrb[2].mxu1 %vm433_vm1, %v5608_v0  ;;  %4975 = vmatprep.subr.mxu0 %v3324_v43  ;;  %v6152_v0 = vsel %vm676_vm2, %v3064_v29, %v3065_v58 }
  0x94   : > { %4773 = vmatprep.mubr.msk.f32.mxu1 %vm433_vm1, %v5647_v37  ;;  %v6159_v44 = vsel %vm676_vm2, %v3067_v16, %v3068_v26  ;;  %v1307_v37 = vsel %vm407_vm0, %v1305_v39, %v1306_v60  ;;  %v6169_v59 = vsel %vm676_vm2, %v3070_v32, %v3071_v17 }
  0x95   : > { %4953 = vmatmul.mubr.msk.f32.gmra.mrb[2].mxu0 %vm433_vm1, %v6133_v45 }
  0x96   : > { %4955 = vmatprep.mubr.msk.f32.mxu0 %vm433_vm1, %v6140_v7 }
  0x97   : > { %4774 = vmatmul.mubr.msk.f32.gmra.mrb[4].mxu1 %vm433_vm1, %v5657_v47  ;;  %v1733_v47 = vld [vmem:[%s6419_s3 + $0x50] sm:$0xff] }
  0x98   : > { %4776 = vmatprep.mubr.msk.f32.mxu1 %vm433_vm1, %v5919_v46 }
  0x99   : > { %4956 = vmatmul.mubr.msk.f32.gmra.mrb[4].mxu0 %vm433_vm1, %v6152_v0 }
  0x9a   : > { %4958 = vmatprep.mubr.msk.f32.mxu0 %vm433_vm1, %v6159_v44 }
  0x9b   : > { %4777 = vmatmul.mubr.msk.f32.gmra.mrb[6].mxu1 %vm433_vm1, %v1307_v37 }
  0x9c   : > { %4781 = vmatprep.mubr.msk.f32.mxu1 %vm433_vm1, %v5766_v25  ;;  %v3443_v25 = vld [vmem:[%s6419_s3 + $0xb8] sm:$0xff] }
  0x9d   : > { %4959 = vmatmul.mubr.msk.f32.gmra.mrb[6].mxu0 %vm433_vm1, %v6169_v59 }
  0x9e   : > { %4963 = vmatprep.mubr.msk.f32.mxu0 %vm433_vm1, %v5937_v1  ;;  %v1710_v1 = vrot.slane %v1544_v22, 1 }
  0x9f   : > { %4782 = vmatmul.mubr.msk.f32.vlgmr.msra.gmra.mrb[0].mxu1 %vm433_vm1, %v5780_v31  ;;  %v1424_v31 = vrot.slane %v6086_v48, 2  ;;  %v1543_v48 = vld [vmem:[%s5458_s30] sm:$0xff] }
  0xa0   : > { %4784 = vmatprep.mubr.msk.f32.mxu1 %vm433_vm1, %v5790_v27  ;;  %4794 = vmatpush3.msra.mxu1 %v1563_v42  ;;  %v1425_v27 = vrot.slane %v389_v53, 2  ;;  %v1709_v46 = vrot.slane %v1543_v48, 1  ;;  %v6449_v42 = vld [vmem:[#allocation8_spill] sm:$0xff] }
  0xa1   : > { %4964 = vmatmul.mubr.msk.f32.vlgmr.msra.gmra.mrb[0].mxu0 %vm433_vm1, %v5945_v13  ;;  %4807 = vmatprep.subr.mxu1 %v1733_v47 }
  0xa2   : > { %4976 = vmatpush3.msra.mxu0 %v3324_v43  ;;  %4966 = vmatprep.mubr.msk.f32.mxu0 %vm433_vm1, %v5957_v11 }
  0xa3   : > { %4785 = vmatmul.mubr.msk.f32.gmra.mrb[2].mxu1 %vm433_vm1, %v5810_v3  ;;  %4989 = vmatprep.subr.mxu0 %v3443_v25  ;;  %v1426_v3 = vsel %vm676_vm2, %v1424_v31, %v1425_v27 }
  0xa4   : > { %4787 = vmatprep.mubr.msk.f32.mxu1 %vm433_vm1, %v5818_v52  ;;  %v1887_v52 = vld [vmem:[%s6419_s3 + $0x58] sm:$0xff] }
  0xa5   : > { %4967 = vmatmul.mubr.msk.f32.gmra.mrb[2].mxu0 %vm433_vm1, %v5962_v6 }
  0xa6   : > { %4969 = vmatprep.mubr.msk.f32.mxu0 %vm433_vm1, %v5975_v30 }
  0xa7   : > { %4788 = vmatmul.mubr.msk.f32.gmra.mrb[4].mxu1 %vm433_vm1, %v5827_v15  ;;  %v3559_v15 = vld [vmem:[%s6419_s3 + $0xc0] sm:$0xff] }
  0xa8   : > { %4790 = vmatprep.mubr.msk.f32.mxu1 %vm433_vm1, %v5990_v36  ;;  %v1711_v36 = vsel %vm407_vm0, %v1709_v46, %v1710_v1 }
  0xa9   : > { %4970 = vmatmul.mubr.msk.f32.gmra.mrb[4].mxu0 %vm433_vm1, %v5981_v21 }
  0xaa   : > { %4972 = vmatprep.mubr.msk.f32.mxu0 %vm433_vm1, %v6001_v4 }
  0xab   : > { %4791 = vmatmul.mubr.msk.f32.gmra.mrb[6].mxu1 %vm433_vm1, %v1426_v3 }
  0xac   : > { %4795 = vmatprep.mubr.msk.f32.mxu1 %vm433_vm1, %v1543_v48 }
  0xad   : > { %4973 = vmatmul.mubr.msk.f32.gmra.mrb[6].mxu0 %vm433_vm1, %v5804_v50 }
  0xae   : > { %4977 = vmatprep.mubr.msk.f32.mxu0 %vm433_vm1, %v6021_v41  ;;  %v2017_v41 = vld [vmem:[%s6419_s3 + $0x60] sm:$0xff] }
  0xaf   : > { %4796 = vmatmul.mubr.msk.f32.vlgmr.msra.gmra.mrb[0].mxu1 %vm433_vm1, %v5468_v12 }
  0xb0   : > { %4798 = vmatprep.mubr.msk.f32.mxu1 %vm433_vm1, %v5474_v14  ;;  %4808 = vmatpush3.msra.mxu1 %v1733_v47 }
  0xb1   : > { %4978 = vmatmul.mubr.msk.f32.vlgmr.msra.gmra.mrb[0].mxu0 %vm433_vm1, %v6031_v19  ;;  %4821 = vmatprep.subr.mxu1 %v1887_v52 }
  0xb2   : > { %4990 = vmatpush3.msra.mxu0 %v3443_v25  ;;  %4980 = vmatprep.mubr.msk.f32.mxu0 %vm433_vm1, %v6051_v5 }
  0xb3   : > { %4799 = vmatmul.mubr.msk.f32.gmra.mrb[2].mxu1 %vm433_vm1, %v5520_v33  ;;  %5003 = vmatprep.subr.mxu0 %v3559_v15 }
  0xb4   : > { %4801 = vmatprep.mubr.msk.f32.mxu1 %vm433_vm1, %v5533_v38 }
  0xb5   : > { %4981 = vmatmul.mubr.msk.f32.gmra.mrb[2].mxu0 %vm433_vm1, %v6058_v18 }
  0xb6   : > { %4983 = vmatprep.mubr.msk.f32.mxu0 %vm433_vm1, %v6072_v49 }
  0xb7   : > { %4802 = vmatmul.mubr.msk.f32.gmra.mrb[4].mxu1 %vm433_vm1, %v5575_v54 }
  0xb8   : > { %4804 = vmatprep.mubr.msk.f32.mxu1 %vm433_vm1, %v5581_v56 }
  0xb9   : > { %4984 = vmatmul.mubr.msk.f32.gmra.mrb[4].mxu0 %vm433_vm1, %v6080_v62 }
  0xba   : > { %4986 = vmatprep.mubr.msk.f32.mxu0 %vm433_vm1, %v6094_v63 }
  0xbb   : > { %4805 = vmatmul.mubr.msk.f32.gmra.mrb[6].mxu1 %vm433_vm1, %v5617_v8 }
  0xbc   : > { %4809 = vmatprep.mubr.msk.f32.mxu1 %vm433_vm1, %v1711_v36 }
  0xbd   : > { %4987 = vmatmul.mubr.msk.f32.gmra.mrb[6].mxu0 %vm433_vm1, %v5831_v35 }
  0xbe   : > { %4991 = vmatprep.mubr.msk.f32.mxu0 %vm433_vm1, %v6108_v61  ;;  %v6444_v61 = vld [vmem:[#allocation11_spill] sm:$0xff] }
  0xbf   : > { %4810 = vmatmul.mubr.msk.f32.vlgmr.msra.gmra.mrb[0].mxu1 %vm433_vm1, %v5511_v28  ;;  %v1863_v28 = vrot.slane %v1543_v48, 2 }
  0xc0   : > { %4812 = vmatprep.mubr.msk.f32.mxu1 %vm433_vm1, %v5525_v34  ;;  %4822 = vmatpush3.msra.mxu1 %v1887_v52  ;;  %v1864_v34 = vrot.slane %v1544_v22, 2 }
  0xc1   : > { %4992 = vmatmul.mubr.msk.f32.vlgmr.msra.gmra.mrb[0].mxu0 %vm433_vm1, %v6118_v40  ;;  %4835 = vmatprep.subr.mxu1 %v2017_v41 }
  0xc2   : > { %5004 = vmatpush3.msra.mxu0 %v3559_v15  ;;  %4994 = vmatprep.mubr.msk.f32.mxu0 %vm433_vm1, %v6133_v45 }
  0xc3   : > { %4813 = vmatmul.mubr.msk.f32.gmra.mrb[2].mxu1 %vm433_vm1, %v5570_v51  ;;  %5017 = vmatprep.subr.mxu0 %v3680_v20  ;;  %v1865_v51 = vsel %vm676_vm2, %v1863_v28, %v1864_v34 }
  0xc4   : > { %4815 = vmatprep.mubr.msk.f32.mxu1 %vm433_vm1, %v5587_v57  ;;  %v6443_v57 = vld [vmem:[#allocation3_spill] sm:$0xff] }
  0xc5   : > { %4995 = vmatmul.mubr.msk.f32.gmra.mrb[2].mxu0 %vm433_vm1, %v6140_v7 }
  0xc6   : > { %4997 = vmatprep.mubr.msk.f32.mxu0 %vm433_vm1, %v6152_v0 }
  0xc7   : > { %4816 = vmatmul.mubr.msk.f32.gmra.mrb[4].mxu1 %vm433_vm1, %v5620_v10  ;;  %v6445_v10 = vld [vmem:[#allocation4_spill] sm:$0xff] }
  0xc8   : > { %4818 = vmatprep.mubr.msk.f32.mxu1 %vm433_vm1, %v5635_v23  ;;  %v6446_v23 = vld [vmem:[#allocation5_spill] sm:$0xff] }
  0xc9   : > { %4998 = vmatmul.mubr.msk.f32.gmra.mrb[4].mxu0 %vm433_vm1, %v6159_v44 }
  0xca   : > { %5000 = vmatprep.mubr.msk.f32.mxu0 %vm433_vm1, %v6169_v59 }
  0xcb   : > { %4819 = vmatmul.mubr.msk.f32.gmra.mrb[6].mxu1 %vm433_vm1, %v6443_v57 }
  0xcc   : > { %4823 = vmatprep.mubr.msk.f32.mxu1 %vm433_vm1, %v1865_v51 }
  0xcd   : > { %5001 = vmatmul.mubr.msk.f32.gmra.mrb[6].mxu0 %vm433_vm1, %v6444_v61 }
  0xce   : > { %5005 = vmatprep.mubr.msk.f32.mxu0 %vm433_vm1, %v5945_v13  ;;  %v6447_v13 = vld [vmem:[#allocation6_spill] sm:$0xff] }
  0xcf   : > { %4824 = vmatmul.mubr.msk.f32.vlgmr.msra.gmra.mrb[0].mxu1 %vm433_vm1, %v6445_v10 }
  0xd0   : > { %4826 = vmatprep.mubr.msk.f32.mxu1 %vm433_vm1, %v6446_v23  ;;  %4836 = vmatpush3.msra.mxu1 %v2017_v41 }
  0xd1   : > { %5006 = vmatmul.mubr.msk.f32.vlgmr.msra.gmra.mrb[0].mxu0 %vm433_vm1, %v5957_v11  ;;  %v6450_v11 = vld [vmem:[#allocation9_spill] sm:$0xff] }
  0xd2   : > { %5018 = vmatpush3.msra.mxu0 %v3680_v20  ;;  %5008 = vmatprep.mubr.msk.f32.mxu0 %vm433_vm1, %v5962_v6  ;;  %v2747_v6 = vld [vmem:[%s5799_s8 + $0x90] sm:$0xff] }
  0xd3   : > { %4827 = vmatmul.mubr.msk.f32.gmra.mrb[2].mxu1 %vm433_vm1, %v6447_v13  ;;  %5031 = vmatprep.subr.mxu0 %v3799_v24 }
  0xd4   : > { %4829 = vmatprep.mubr.msk.f32.mxu1 %vm433_vm1, %v6448_v9 }
  0xd5   : > { %5009 = vmatmul.mubr.msk.f32.gmra.mrb[2].mxu0 %vm433_vm1, %v5975_v30 }
  0xd6   : > { %5011 = vmatprep.mubr.msk.f32.mxu0 %vm433_vm1, %v5981_v21 }
  0xd7   : > { %4830 = vmatmul.mubr.msk.f32.gmra.mrb[4].mxu1 %vm433_vm1, %v6449_v42 }
  0xd8   : > { %4832 = vmatprep.mubr.msk.f32.mxu1 %vm433_vm1, %v6450_v11 }
  0xd9   : > { %5012 = vmatmul.mubr.msk.f32.gmra.mrb[4].mxu0 %vm433_vm1, %v6001_v4 }
  0xda   : > { %5014 = vmatprep.mubr.msk.f32.mxu0 %vm433_vm1, %v5804_v50 }
  0xdb   : > { %4833 = vmatmul.mubr.msk.f32.gmra.mrb[6].mxu1 %vm433_vm1, %v6451_v2 }
  0xdc   : > { %4837 = vmatprep.mubr.msk.f32.mxu1 %vm433_vm1, %v5468_v12  ;;  %v2748_v12 = vld [vmem:[%s5799_s8 + $0x98] sm:$0x3] }
  0xdd   : > { %5015 = vmatmul.mubr.msk.f32.gmra.mrb[6].mxu0 %vm433_vm1, %v2747_v6 }
  0xde   : > { %5019 = vmatprep.mubr.msk.f32.mxu0 %vm433_vm1, %v6031_v19 }
  0xdf   : > { %4838 = vmatmul.mubr.msk.f32.vlgmr.msra.gmra.mrb[0].mxu1 %vm433_vm1, %v5474_v14  ;;  %v3677_v14 = vrot.slane %v2747_v6, 1 }
  0xe0   : > { %4840 = vmatprep.mubr.msk.f32.mxu1 %vm433_vm1, %v5520_v33  ;;  %v3678_v33 = vrot.slane %v2748_v12, 1 }
  0xe1   : > { %5020 = vmatmul.mubr.msk.f32.vlgmr.msra.gmra.mrb[0].mxu0 %vm433_vm1, %v6051_v5 }
  0xe2   : > { %5032 = vmatpush3.msra.mxu0 %v3799_v24  ;;  %5022 = vmatprep.mubr.msk.f32.mxu0 %vm433_vm1, %v6058_v18 }
  0xe3   : > { %4841 = vmatmul.mubr.msk.f32.gmra.mrb[2].mxu1 %vm433_vm1, %v5533_v38  ;;  %v3679_v38 = vsel %vm407_vm0, %v3677_v14, %v3678_v33 }
  0xe4   : > { %4843 = vmatprep.mubr.msk.f32.mxu1 %vm433_vm1, %v5575_v54  ;;  %v6452_v54 = vld [vmem:[#allocation2_spill] sm:$0xff] }
  0xe5   : > { %5023 = vmatmul.mubr.msk.f32.gmra.mrb[2].mxu0 %vm433_vm1, %v6072_v49 }
  0xe6   : > { %5025 = vmatprep.mubr.msk.f32.mxu0 %vm433_vm1, %v6080_v62 }
  0xe7   : > { %4844 = vmatmul.mubr.msk.f32.gmra.mrb[4].mxu1 %vm433_vm1, %v5581_v56  ;;  %v3796_v56 = vrot.slane %v2747_v6, 2 }
  0xe8   : > { %4846 = vmatprep.mubr.msk.f32.mxu1 %vm433_vm1, %v5617_v8  ;;  %v3797_v8 = vrot.slane %v2748_v12, 2 }
  0xe9   : > { %5026 = vmatmul.mubr.msk.f32.gmra.mrb[4].mxu0 %vm433_vm1, %v6094_v63 }
  0xea   : > { %5028 = vmatprep.mubr.msk.f32.mxu0 %vm433_vm1, %v5831_v35  ;;  %v3798_v50 = vsel %vm676_vm2, %v3796_v56, %v3797_v8  ;;  %v3938_v35 = vld [vmem:[%s6421_s5] sm:$0xff] }
  0xeb   : > { %4847 = vmatmul.mubr.msk.f32.gmra.mrb[6].mxu1 %vm433_vm1, %v6452_v54  ;;  %5045 = vmatprep.subr.mxu1 %v3938_v35 }
  0xec   : > { %5046 = vmatpush3.msra.mxu1 %v3938_v35 }
  0xed   : > { %5029 = vmatmul.mubr.msk.f32.gmra.mrb[6].mxu0 %vm433_vm1, %v3679_v38 }
  0xee   : > { %5033 = vmatprep.mubr.msk.f32.mxu0 %vm433_vm1, %v6118_v40  ;;  %v4403_v40 = vld [vmem:[%s6420_s4] ss:$0 sm:$0xff] }
  0xf1   : > { %5034 = vmatmul.mubr.msk.f32.vlgmr.msra.gmra.mrb[0].mxu0 %vm433_vm1, %v6133_v45 }
  0xf2   : > { %5036 = vmatprep.mubr.msk.f32.mxu0 %vm433_vm1, %v6140_v7 }
  0xf5   : > { %5037 = vmatmul.mubr.msk.f32.gmra.mrb[2].mxu0 %vm433_vm1, %v6152_v0 }
  0xf6   : > { %5039 = vmatprep.mubr.msk.f32.mxu0 %vm433_vm1, %v6159_v44 }
  0xf9   : > { %5040 = vmatmul.mubr.msk.f32.gmra.mrb[4].mxu0 %vm433_vm1, %v6169_v59 }
  0xfa   : > { %5042 = vmatprep.mubr.msk.f32.mxu0 %vm433_vm1, %v6444_v61 }
  0xfd   : > { %5043 = vmatmul.mubr.msk.f32.gmra.mrb[6].mxu0 %vm433_vm1, %v3798_v50 }
 0x1b2   : > { %v4839_v30 = vpop.f32.mrb[0].mxu1 }
 0x1b3   : > { %v2087_v21 = vpop.f32.mrb[1].mxu1 }
 0x1b6   : > { %v4842_v4 = vpop.f32.mrb[2].mxu1 }
 0x1b7   : > { %v2097_v19 = vpop.f32.mrb[3].mxu1 }
 0x1ba   : > { %v4845_v5 = vpop.f32.mrb[4].mxu1 }
 0x1bb   : > { %v2107_v18 = vpop.f32.mrb[5].mxu1 }
 0x1be   : > { %v4848_v49 = vpop.f32.mrb[6].mxu1 }
 0x1bf   : > { %v2117_v62 = vpop.f32.mrb[7].mxu1 }
 0x1c4   : > { %v5035_v63 = vpop.f32.mrb[0].mxu0 }
 0x1c5   : > { %v5059_v55 = vadd.f32 %v5035_v63, %v4839_v30  ;;  %v3868_v43 = vpop.f32.mrb[1].mxu0 }
 0x1c6   : > { %v5060_v53 = vadd.f32 %v3868_v43, %v2087_v21 }
 0x1c7   : > { %v3923_v45 = vadd.f32 %v5059_v55, %v4403_v40 }
 0x1c8   : > { %v3922_v29 = vadd.f32 %v5060_v53, %v4403_v40  ;;  %v5038_v58 = vpop.f32.mrb[2].mxu0 }
 0x1c9   : > { %v5061_v7 = vadd.f32 %v5038_v58, %v4842_v4  ;;  %v3878_v16 = vpop.f32.mrb[3].mxu0  ;;  %v3931_v60 = vmax.f32 %v3923_v45, 0.0 }
 0x1ca   : > { %v3930_v26 = vmax.f32 %v3922_v29, 0.0  ;;  %v5062_v39 = vadd.f32 %v3878_v16, %v2097_v19 }
 0x1cb   : > { %v3925_v0 = vadd.f32 %v5061_v7, %v4403_v40 }
 0x1cc   : > { %v3924_v32 = vadd.f32 %v5062_v39, %v4403_v40  ;;  %v5041_v17 = vpop.f32.mrb[4].mxu0  ;;  %5047 = vmatprep.mubr.msk.f32.mxu1 %vm433_vm1, %v3930_v26 }
 0x1cd   : > { %v5063_v44 = vadd.f32 %v5041_v17, %v4845_v5  ;;  %v3888_v37 = vpop.f32.mrb[5].mxu0  ;;  %5048 = vmatmul.mubr.msk.f32.vlgmr.msra.gmra.mrb[8].mxu1 %vm433_vm1, %v3931_v60  ;;  %v3933_v25 = vmax.f32 %v3925_v0, 0.0 }
 0x1ce   : > { %v3932_v59 = vmax.f32 %v3924_v32, 0.0  ;;  %v5064_v47 = vadd.f32 %v3888_v37, %v2107_v18 }
 0x1cf   : > { %v3927_v31 = vadd.f32 %v5063_v44, %v4403_v40 }
 0x1d0   : > { %v3926_v27 = vadd.f32 %v5064_v47, %v4403_v40  ;;  %v5044_v3 = vpop.f32.mrb[6].mxu0  ;;  %5050 = vmatprep.mubr.msk.f32.mxu1 %vm433_vm1, %v3932_v59 }
 0x1d1   : > { %v5065_v48 = vadd.f32 %v5044_v3, %v4848_v49  ;;  %v3898_v52 = vpop.f32.mrb[7].mxu0  ;;  %5051 = vmatmul.mubr.msk.f32.gmra.mrb[10].mxu1 %vm433_vm1, %v3933_v25  ;;  %v3935_v46 = vmax.f32 %v3927_v31, 0.0 }
 0x1d2   : > { %v3934_v15 = vmax.f32 %v3926_v27, 0.0  ;;  %v5066_v22 = vadd.f32 %v3898_v52, %v2117_v62 }
 0x1d3   : > { %v3929_v1 = vadd.f32 %v5065_v48, %v4403_v40 }
 0x1d4   : > { %v3928_v36 = vadd.f32 %v5066_v22, %v4403_v40  ;;  %5053 = vmatprep.mubr.msk.f32.mxu1 %vm433_vm1, %v3934_v15 }
 0x1d5   : > { %5054 = vmatmul.mubr.msk.f32.gmra.mrb[12].mxu1 %vm433_vm1, %v3935_v46  ;;  %v3937_v20 = vmax.f32 %v3929_v1, 0.0 }
 0x1d6   : > { %v3936_v41 = vmax.f32 %v3928_v36, 0.0 }
 0x1d8   : > { %5056 = vmatprep.mubr.msk.f32.mxu1 %vm433_vm1, %v3936_v41 }
 0x1d9   : > { %5057 = vmatmul.mubr.msk.f32.gmra.mrb[14].mxu1 %vm433_vm1, %v3937_v20 }
 0x2a0   : > { %v5049_v28 = vpop.f32.mrb[8].mxu1 }
 0x2a1   : > { %4070 = vst.msk [vmem:[%s367_s28 + $0x8] sm:$0xff] %vm4068_vm3, %v5049_v28  ;;  %v4029_v34 = vpop.f32.mrb[9].mxu1 }
 0x2a2   : > { %4069 = vst.msk [vmem:[%s367_s28] sm:$0xff] %vm4068_vm3, %v4029_v34 }
 0x2a4   : > { %v5052_v51 = vpop.f32.mrb[10].mxu1 }
 0x2a5   : > { %4072 = vst.msk [vmem:[%s367_s28 + $0x18] sm:$0xff] %vm4068_vm3, %v5052_v51  ;;  %v4039_v57 = vpop.f32.mrb[11].mxu1 }
 0x2a6   : > { %4071 = vst.msk [vmem:[%s367_s28 + $0x10] sm:$0xff] %vm4068_vm3, %v4039_v57 }
 0x2a8   : > { %v5055_v61 = vpop.f32.mrb[12].mxu1 }
 0x2a9   : > { %4074 = vst.msk [vmem:[%s367_s28 + $0x28] sm:$0xff] %vm4068_vm3, %v5055_v61  ;;  %v4049_v10 = vpop.f32.mrb[13].mxu1 }
 0x2aa   : > { %4073 = vst.msk [vmem:[%s367_s28 + $0x20] sm:$0xff] %vm4068_vm3, %v4049_v10 }
 0x2ac   : > { %v5058_v23 = vpop.f32.mrb[14].mxu1 }
 0x2ad   : > { %4076 = vst.msk [vmem:[%s367_s28 + $0x38] sm:$0xff] %vm4068_vm3, %v5058_v23  ;;  %v4059_v24 = vpop.f32.mrb[15].mxu1 }
 0x2ae   : > { %4075 = vst.msk [vmem:[%s367_s28 + $0x30] sm:$0xff] %vm4068_vm3, %v4059_v24 }
 0x2af PF: > { %s16_s25 = sadd.s32 1, %s5348_s25   ;;  %s6453_s21 = smov %s5340_s23 }
 0x2b0   : > { %p13_p9 = scmp.ge.s32.totalorder %s16_s25, 18   ;;  %s6454_s22 = smov %s5344_s24 }
 0x2b1   : > { %s6455_s23 = smov %s6458_s26  ;;  %s6456_s24 = smov %s6462_s27 }
 0x2b2   :  { %15 = sbr.rel (!%p13_p9) target bundleno = 3 (0x3), region = 80 }

</bundles_post_ra>
